<compile_context>
chip_gen: v5e
topology: v5e:2x2
jax: 0.10.0
libtpu: 0.0.40
codegen_flags: <defaults>
</compile_context>

<pallas_src>
import jax
import jax.numpy as jnp
from jax import lax
from jax.experimental import pallas as pl
from jax.experimental.pallas import tpu as pltpu


def _round_up(x, m):
    return ((x + m - 1) // m) * m


def _sigmoid(x):
    # Numerically stable sigmoid via a single tanh (EUP op, no exp overflow).
    return 0.5 * (jnp.tanh(0.5 * x) + 1.0)


def _make_lstm_kernel(num_layers, Tc, Bp, Hp):
    """Builds the Pallas kernel for a fixed (static) padded config."""

    def kernel(*refs):
        # inputs: x, (w_ih, w_hh, b) * L, w_fc, b_fc ; output: out ;
        # scratch: proj, seq, h_state, c_state
        x_ref = refs[0]                                   # (Tc*Bp, D)
        layer_refs = refs[1:1 + 3 * num_layers]
        w_fc_ref = refs[1 + 3 * num_layers]               # (Hp, Op)
        b_fc_ref = refs[2 + 3 * num_layers]               # (1, Op)
        out_ref = refs[3 + 3 * num_layers]                # (Tc*Bp, Op)
        proj_ref = refs[4 + 3 * num_layers]               # (Tc*Bp, 4Hp)
        seq_ref = refs[5 + 3 * num_layers]                # (Tc*Bp, Hp)
        h_state = refs[6 + 3 * num_layers]                # (L, Bp, Hp) persistent
        c_state = refs[7 + 3 * num_layers]                # (L, Bp, Hp) persistent

        @pl.when(pl.program_id(0) == 0)
        def _init_states():
            h_state[...] = jnp.zeros_like(h_state)
            c_state[...] = jnp.zeros_like(c_state)

        def run_layer(layer_idx, x_flat, w_ih_ref, w_hh_ref, b_ref):
            # (1) Hoisted input projection + bias for the whole chunk:
            #     one MXU-friendly (Tc*Bp, Din) @ (Din, 4Hp) matmul.
            proj_ref[...] = (
                jnp.dot(x_flat, w_ih_ref[...], preferred_element_type=jnp.float32)
                + b_ref[...]
            )

            # (2) Serial recurrence: only h @ W_hh + elementwise gates.
            def step(t, carry):
                h, c = carry
                row = pl.multiple_of(t * Bp, Bp)
                gates = proj_ref[pl.ds(row, Bp), :] + jnp.dot(
                    h, w_hh_ref[...], preferred_element_type=jnp.float32)
                # 128-aligned lane slices (Hp is a multiple of 128).
                i_g = _sigmoid(gates[:, 0 * Hp:1 * Hp])
                f_g = _sigmoid(gates[:, 1 * Hp:2 * Hp])
                g_g = jnp.tanh(gates[:, 2 * Hp:3 * Hp])
                o_g = _sigmoid(gates[:, 3 * Hp:4 * Hp])
                c_new = f_g * c + i_g * g_g
                h_new = o_g * jnp.tanh(c_new)
                seq_ref[pl.ds(row, Bp), :] = h_new
                return h_new, c_new

            h0 = h_state[layer_idx]
            c0 = c_state[layer_idx]
            h_fin, c_fin = lax.fori_loop(0, Tc, step, (h0, c0),
                                         unroll=True if Tc <= 8 else False)
            h_state[layer_idx] = h_fin
            c_state[layer_idx] = c_fin

        # Layer 0 consumes the streamed x chunk; layers >= 1 consume the seq
        # scratch (read in bulk by the projection before it is overwritten).
        run_layer(0, x_ref[...], layer_refs[0], layer_refs[1], layer_refs[2])
        for l in range(1, num_layers):
            run_layer(l, seq_ref[...],
                      layer_refs[3 * l + 0],
                      layer_refs[3 * l + 1],
                      layer_refs[3 * l + 2])

        # (3) FC head: one batched matmul per chunk, lane-dense store.
        out_ref[...] = (
            jnp.dot(seq_ref[...], w_fc_ref[...], preferred_element_type=jnp.float32)
            + b_fc_ref[...]
        ).astype(out_ref.dtype)

    return kernel


def _pad_gate_weight(w, din_p, H, Hp):
    """PyTorch (4H, din) gate weight -> padded, transposed (din_p, 4Hp)."""
    din = w.shape[1]
    w4 = w.reshape(4, H, din).astype(jnp.float32)          # gates i, f, g, o
    out = jnp.zeros((4, Hp, din_p), jnp.float32)
    out = out.at[:, :H, :din].set(w4)
    return jnp.transpose(out, (2, 0, 1)).reshape(din_p, 4 * Hp)


def _pad_gate_bias(b_ih, b_hh, H, Hp):
    b = (b_ih + b_hh).reshape(4, H).astype(jnp.float32)
    out = jnp.zeros((4, Hp), jnp.float32).at[:, :H].set(b)
    return out.reshape(1, 4 * Hp)


def lstm_forward(x, params, hidden_dim, num_layers, *, time_chunk=None):
    """x: (B, T, input_dim) float32, batch-first (PyTorch batch_first=True)."""
    B, T, D = x.shape
    H = hidden_dim
    O = params["fc_w"].shape[0]

    Hp = _round_up(H, 128)          # lane-aligned hidden (gate slices 128-aligned)
    Bp = _round_up(B, 8)            # full sublane tiles for the MXU
    Op = _round_up(O, 128)          # lane-dense FC output (unmasked stores)
    Tc = time_chunk if time_chunk is not None else max(1, min(T, 16))
    Tp = _round_up(T, Tc)
    num_chunks = Tp // Tc

    # Zero-padding is exact: padded hidden units keep h = c = 0 for all t
    # (zero weights + zero bias => i=f=o=0.5, g=0 => c'=0, h'=0), padded batch
    # rows / time steps never feed real outputs.
    x_tm = jnp.transpose(x.astype(jnp.float32), (1, 0, 2))       # (T, B, D)
    x_p = jnp.zeros((Tp, Bp, D), jnp.float32).at[:T, :B, :].set(x_tm)
    x_flat = x_p.reshape(Tp * Bp, D)                             # flat time-major

    inputs = [x_flat]
    in_specs = [pl.BlockSpec((Tc * Bp, D), lambda k: (k, 0))]
    for l, (w_ih, w_hh, b_ih, b_hh) in enumerate(params["lstm"]):
        din_p = D if l == 0 else Hp
        inputs.append(_pad_gate_weight(w_ih, din_p, H, Hp))       # (din_p, 4Hp)
        inputs.append(_pad_gate_weight(w_hh, Hp, H, Hp))          # (Hp, 4Hp)
        inputs.append(_pad_gate_bias(b_ih, b_hh, H, Hp))          # (1, 4Hp)
        in_specs.append(pl.BlockSpec((din_p, 4 * Hp), lambda k: (0, 0)))
        in_specs.append(pl.BlockSpec((Hp, 4 * Hp), lambda k: (0, 0)))
        in_specs.append(pl.BlockSpec((1, 4 * Hp), lambda k: (0, 0)))

    w_fc = jnp.zeros((Hp, Op), jnp.float32).at[:H, :O].set(
        jnp.transpose(params["fc_w"]).astype(jnp.float32))
    b_fc = jnp.zeros((1, Op), jnp.float32).at[0, :O].set(
        params["fc_b"].astype(jnp.float32))
    inputs += [w_fc, b_fc]
    in_specs += [pl.BlockSpec((Hp, Op), lambda k: (0, 0)),
                 pl.BlockSpec((1, Op), lambda k: (0, 0))]

    kernel = _make_lstm_kernel(num_layers, Tc, Bp, Hp)

    out_flat = pl.pallas_call(
        kernel,
        out_shape=jax.ShapeDtypeStruct((Tp * Bp, Op), jnp.float32),
        grid=(num_chunks,),
        in_specs=in_specs,
        out_specs=pl.BlockSpec((Tc * Bp, Op), lambda k: (k, 0)),
        scratch_shapes=[
            pltpu.VMEM((Tc * Bp, 4 * Hp), jnp.float32),     # input projection
            pltpu.VMEM((Tc * Bp, Hp), jnp.float32),         # layer output sequence
            pltpu.VMEM((num_layers, Bp, Hp), jnp.float32),  # h carry per layer
            pltpu.VMEM((num_layers, Bp, Hp), jnp.float32),  # c carry per layer
        ],
        compiler_params=pltpu.CompilerParams(
            dimension_semantics=("arbitrary",),             # recurrent over chunks
            vmem_limit_bytes=64 * 1024 * 1024,
        ),
    )(*inputs)

    out = out_flat.reshape(Tp, Bp, Op)[:T, :B, :O]
    return jnp.transpose(out, (1, 0, 2))                    # (B, T, O)


def init_params(key, input_dim, hidden_dim, num_layers, output_dim):
    """Deterministic init matching PyTorch's uniform(-1/sqrt(H), 1/sqrt(H))."""
    k = 1.0 / jnp.sqrt(jnp.float32(hidden_dim))
    params = {"lstm": []}
    for l in range(num_layers):
        din = input_dim if l == 0 else hidden_dim
        key, k1, k2, k3, k4 = jax.random.split(key, 5)
        w_ih = jax.random.uniform(k1, (4 * hidden_dim, din), jnp.float32, -k, k)
        w_hh = jax.random.uniform(k2, (4 * hidden_dim, hidden_dim), jnp.float32, -k, k)
        b_ih = jax.random.uniform(k3, (4 * hidden_dim,), jnp.float32, -k, k)
        b_hh = jax.random.uniform(k4, (4 * hidden_dim,), jnp.float32, -k, k)
        params["lstm"].append((w_ih, w_hh, b_ih, b_hh))
    key, k5, k6 = jax.random.split(key, 3)
    params["fc_w"] = jax.random.uniform(k5, (output_dim, hidden_dim), jnp.float32, -k, k)
    params["fc_b"] = jax.random.uniform(k6, (output_dim,), jnp.float32, -k, k)
    return params


def lstm_reference(x, params, hidden_dim, num_layers):
    """Pure-JAX reference (mirrors torch.nn.LSTM + Linear forward)."""
    B, T, _ = x.shape
    H = hidden_dim
    seq = x
    for l in range(num_layers):
        w_ih, w_hh, b_ih, b_hh = params["lstm"][l]
        h = jnp.zeros((B, H), jnp.float32)
        c = jnp.zeros((B, H), jnp.float32)
        outs = []
        for t in range(T):
            g = seq[:, t, :] @ w_ih.T + h @ w_hh.T + b_ih + b_hh
            i = jax.nn.sigmoid(g[:, 0 * H:1 * H])
            f = jax.nn.sigmoid(g[:, 1 * H:2 * H])
            gg = jnp.tanh(g[:, 2 * H:3 * H])
            o = jax.nn.sigmoid(g[:, 3 * H:4 * H])
            c = f * c + i * gg
            h = o * jnp.tanh(c)
            outs.append(h)
        seq = jnp.stack(outs, axis=1)
    return seq @ params["fc_w"].T + params["fc_b"]


if __name__ == "__main__":
    INPUT_DIM = 16
    HIDDEN_DIM = 32
    NUM_LAYERS = 2
    OUTPUT_DIM = 8
    B, T = 2, 8

    key = jax.random.PRNGKey(0)
    key, xk = jax.random.split(key)
    x = jax.random.normal(xk, (B, T, INPUT_DIM), dtype=jnp.float32)
    params = init_params(key, INPUT_DIM, HIDDEN_DIM, NUM_LAYERS, OUTPUT_DIM)

    # time_chunk=4 -> 2 grid steps, exercises the cross-chunk (h, c) carry path.
    out = lstm_forward(x, params, HIDDEN_DIM, NUM_LAYERS, time_chunk=4)
    out = jax.block_until_ready(out)

    ref = lstm_reference(x, params, HIDDEN_DIM, NUM_LAYERS)
    assert out.shape == (B, T, OUTPUT_DIM), out.shape
    assert jnp.allclose(out, ref, atol=1e-3, rtol=1e-3), \
        float(jnp.max(jnp.abs(out - ref)))

    print("KERNEL_OK")
</pallas_src>

<mosaic_0001>
module attributes {stable_mosaic.version = 11 : i64} {
  func.func @kernel(%arg0: i32, %arg1: memref<32x16xf32, #tpu.memory_space<vmem>>, %arg2: memref<16x512xf32, #tpu.memory_space<vmem>>, %arg3: memref<128x512xf32, #tpu.memory_space<vmem>>, %arg4: memref<1x512xf32, #tpu.memory_space<vmem>>, %arg5: memref<128x512xf32, #tpu.memory_space<vmem>>, %arg6: memref<128x512xf32, #tpu.memory_space<vmem>>, %arg7: memref<1x512xf32, #tpu.memory_space<vmem>>, %arg8: memref<128x128xf32, #tpu.memory_space<vmem>>, %arg9: memref<1x128xf32, #tpu.memory_space<vmem>>, %arg10: memref<32x128xf32, #tpu.memory_space<vmem>>, %arg11: memref<32x512xf32, #tpu.memory_space<vmem>>, %arg12: memref<32x128xf32, #tpu.memory_space<vmem>>, %arg13: memref<2x8x128xf32, #tpu.memory_space<vmem>>, %arg14: memref<2x8x128xf32, #tpu.memory_space<vmem>>) attributes {dimension_semantics = [#tpu.dimension_semantics<arbitrary>], iteration_bounds = array<i64: 2>, scalar_prefetch = 0 : i64, scratch_operands = 4 : i64, tpu.core_type = #tpu.core_type<tc>, window_params = [{transform_indices = @transform_0, window_bounds = array<i64: 32, 16>}, {pipeline_mode = #tpu.pipeline_mode<synchronous>, transform_indices = @transform_1, window_bounds = array<i64: 16, 512>}, {pipeline_mode = #tpu.pipeline_mode<synchronous>, transform_indices = @transform_2, window_bounds = array<i64: 128, 512>}, {pipeline_mode = #tpu.pipeline_mode<synchronous>, transform_indices = @transform_3, window_bounds = array<i64: 1, 512>}, {pipeline_mode = #tpu.pipeline_mode<synchronous>, transform_indices = @transform_4, window_bounds = array<i64: 128, 512>}, {pipeline_mode = #tpu.pipeline_mode<synchronous>, transform_indices = @transform_5, window_bounds = array<i64: 128, 512>}, {pipeline_mode = #tpu.pipeline_mode<synchronous>, transform_indices = @transform_6, window_bounds = array<i64: 1, 512>}, {pipeline_mode = #tpu.pipeline_mode<synchronous>, transform_indices = @transform_7, window_bounds = array<i64: 128, 128>}, {pipeline_mode = #tpu.pipeline_mode<synchronous>, transform_indices = @transform_8, window_bounds = array<i64: 1, 128>}, {transform_indices = @transform_9, window_bounds = array<i64: 32, 128>}]} {
    %c0_i32 = arith.constant 0 : i32
    %0 = arith.cmpi eq, %arg0, %c0_i32 : i32
    %1 = arith.extui %0 : i1 to i32
    %c0_i32_0 = arith.constant 0 : i32
    %2 = arith.cmpi ne, %1, %c0_i32_0 : i32
    scf.if %2 {
      %cst_174 = arith.constant 0.000000e+00 : f32
      %364 = vector.broadcast %cst_174 : f32 to vector<2x8x128xf32>
      %c0_175 = arith.constant 0 : index
      %c0_176 = arith.constant 0 : index
      %c0_177 = arith.constant 0 : index
      %365 = vector.load %arg13[%c0_175, %c0_176, %c0_177] : memref<2x8x128xf32, #tpu.memory_space<vmem>>, vector<2x8x128xf32>
      tpu.vector_store %arg13[%c0_175, %c0_176, %c0_177], %364 {strides = array<i32>} : memref<2x8x128xf32, #tpu.memory_space<vmem>>, vector<2x8x128xf32>,
      %cst_178 = arith.constant 0.000000e+00 : f32
      %366 = vector.broadcast %cst_178 : f32 to vector<2x8x128xf32>
      %c0_179 = arith.constant 0 : index
      %c0_180 = arith.constant 0 : index
      %c0_181 = arith.constant 0 : index
      %367 = vector.load %arg14[%c0_179, %c0_180, %c0_181] : memref<2x8x128xf32, #tpu.memory_space<vmem>>, vector<2x8x128xf32>
      tpu.vector_store %arg14[%c0_179, %c0_180, %c0_181], %366 {strides = array<i32>} : memref<2x8x128xf32, #tpu.memory_space<vmem>>, vector<2x8x128xf32>,
    } else {
    }
    %c0 = arith.constant 0 : index
    %c0_1 = arith.constant 0 : index
    %3 = vector.load %arg1[%c0, %c0_1] : memref<32x16xf32, #tpu.memory_space<vmem>>, vector<32x16xf32>
    %c0_2 = arith.constant 0 : index
    %c0_3 = arith.constant 0 : index
    %4 = vector.load %arg2[%c0_2, %c0_3] : memref<16x512xf32, #tpu.memory_space<vmem>>, vector<16x512xf32>
    %cst = arith.constant dense<0.000000e+00> : vector<32x512xf32>
    %5 = tpu.matmul %3, %4, %cst {dimension_numbers = #tpu.dot_dimension_numbers<[1], [0], [0], [1], [0, 0, 1, 1], [], []>} : vector<32x16xf32>, vector<16x512xf32>, vector<32x512xf32> -> vector<32x512xf32>
    %c0_4 = arith.constant 0 : index
    %c0_5 = arith.constant 0 : index
    %6 = vector.load %arg4[%c0_4, %c0_5] : memref<1x512xf32, #tpu.memory_space<vmem>>, vector<1x512xf32>
    %7 = vector.broadcast %6 : vector<1x512xf32> to vector<32x512xf32>
    %8 = arith.addf %5, %7 : vector<32x512xf32>
    %c0_6 = arith.constant 0 : index
    %c0_7 = arith.constant 0 : index
    %9 = vector.load %arg11[%c0_6, %c0_7] : memref<32x512xf32, #tpu.memory_space<vmem>>, vector<32x512xf32>
    tpu.vector_store %arg11[%c0_6, %c0_7], %8 {strides = array<i32>} : memref<32x512xf32, #tpu.memory_space<vmem>>, vector<32x512xf32>,
    %c0_8 = arith.constant 0 : index
    %c0_9 = arith.constant 0 : index
    %c0_10 = arith.constant 0 : index
    %10 = vector.load %arg13[%c0_8, %c0_9, %c0_10] : memref<2x8x128xf32, #tpu.memory_space<vmem>>, vector<1x8x128xf32>
    %11 = vector.shape_cast %10 : vector<1x8x128xf32> to vector<8x128xf32>
    %c0_11 = arith.constant 0 : index
    %c0_12 = arith.constant 0 : index
    %c0_13 = arith.constant 0 : index
    %12 = vector.load %arg14[%c0_11, %c0_12, %c0_13] : memref<2x8x128xf32, #tpu.memory_space<vmem>>, vector<1x8x128xf32>
    %13 = vector.shape_cast %12 : vector<1x8x128xf32> to vector<8x128xf32>
    %c0_i32_14 = arith.constant 0 : i32
    %c8_i32 = arith.constant 8 : i32
    %14 = arith.muli %c0_i32_14, %c8_i32 : i32
    %15 = tpu.assume_multiple %14, 8 : i32
    %16 = arith.index_cast %15 : i32 to index
    %c0_15 = arith.constant 0 : index
    %17 = vector.load %arg11[%16, %c0_15] : memref<32x512xf32, #tpu.memory_space<vmem>>, vector<8x512xf32>
    %c0_16 = arith.constant 0 : index
    %c0_17 = arith.constant 0 : index
    %18 = vector.load %arg3[%c0_16, %c0_17] : memref<128x512xf32, #tpu.memory_space<vmem>>, vector<128x512xf32>
    %cst_18 = arith.constant dense<0.000000e+00> : vector<8x512xf32>
    %19 = tpu.matmul %11, %18, %cst_18 {dimension_numbers = #tpu.dot_dimension_numbers<[1], [0], [0], [1], [0, 0, 1, 1], [], []>} : vector<8x128xf32>, vector<128x512xf32>, vector<8x512xf32> -> vector<8x512xf32>
    %20 = arith.addf %17, %19 : vector<8x512xf32>
    %21 = vector.extract_strided_slice %20 {offsets = [0, 0], sizes = [8, 128], strides = [1, 1]} : vector<8x512xf32> to vector<8x128xf32>
    %cst_19 = arith.constant 5.000000e-01 : f32
    %22 = vector.broadcast %cst_19 : f32 to vector<8x128xf32>
    %23 = arith.mulf %22, %21 : vector<8x128xf32>
    %24 = math.tanh %23 : vector<8x128xf32>
    %cst_20 = arith.constant 1.000000e+00 : f32
    %25 = vector.broadcast %cst_20 : f32 to vector<8x128xf32>
    %26 = arith.addf %24, %25 : vector<8x128xf32>
    %cst_21 = arith.constant 5.000000e-01 : f32
    %27 = vector.broadcast %cst_21 : f32 to vector<8x128xf32>
    %28 = arith.mulf %27, %26 : vector<8x128xf32>
    %29 = vector.extract_strided_slice %20 {offsets = [0, 128], sizes = [8, 128], strides = [1, 1]} : vector<8x512xf32> to vector<8x128xf32>
    %cst_22 = arith.constant 5.000000e-01 : f32
    %30 = vector.broadcast %cst_22 : f32 to vector<8x128xf32>
    %31 = arith.mulf %30, %29 : vector<8x128xf32>
    %32 = math.tanh %31 : vector<8x128xf32>
    %cst_23 = arith.constant 1.000000e+00 : f32
    %33 = vector.broadcast %cst_23 : f32 to vector<8x128xf32>
    %34 = arith.addf %32, %33 : vector<8x128xf32>
    %cst_24 = arith.constant 5.000000e-01 : f32
    %35 = vector.broadcast %cst_24 : f32 to vector<8x128xf32>
    %36 = arith.mulf %35, %34 : vector<8x128xf32>
    %37 = vector.extract_strided_slice %20 {offsets = [0, 256], sizes = [8, 128], strides = [1, 1]} : vector<8x512xf32> to vector<8x128xf32>
    %38 = math.tanh %37 : vector<8x128xf32>
    %39 = vector.extract_strided_slice %20 {offsets = [0, 384], sizes = [8, 128], strides = [1, 1]} : vector<8x512xf32> to vector<8x128xf32>
    %cst_25 = arith.constant 5.000000e-01 : f32
    %40 = vector.broadcast %cst_25 : f32 to vector<8x128xf32>
    %41 = arith.mulf %40, %39 : vector<8x128xf32>
    %42 = math.tanh %41 : vector<8x128xf32>
    %cst_26 = arith.constant 1.000000e+00 : f32
    %43 = vector.broadcast %cst_26 : f32 to vector<8x128xf32>
    %44 = arith.addf %42, %43 : vector<8x128xf32>
    %cst_27 = arith.constant 5.000000e-01 : f32
    %45 = vector.broadcast %cst_27 : f32 to vector<8x128xf32>
    %46 = arith.mulf %45, %44 : vector<8x128xf32>
    %47 = arith.mulf %36, %13 : vector<8x128xf32>
    %48 = arith.mulf %28, %38 : vector<8x128xf32>
    %49 = arith.addf %47, %48 : vector<8x128xf32>
    %50 = math.tanh %49 : vector<8x128xf32>
    %51 = arith.mulf %46, %50 : vector<8x128xf32>
    %52 = arith.index_cast %15 : i32 to index
    %c0_28 = arith.constant 0 : index
    %53 = vector.load %arg12[%52, %c0_28] : memref<32x128xf32, #tpu.memory_space<vmem>>, vector<8x128xf32>
    tpu.vector_store %arg12[%52, %c0_28], %51 {strides = array<i32>} : memref<32x128xf32, #tpu.memory_space<vmem>>, vector<8x128xf32>,
    %c1_i32 = arith.constant 1 : i32
    %c8_i32_29 = arith.constant 8 : i32
    %54 = arith.muli %c1_i32, %c8_i32_29 : i32
    %55 = tpu.assume_multiple %54, 8 : i32
    %56 = arith.index_cast %55 : i32 to index
    %c0_30 = arith.constant 0 : index
    %57 = vector.load %arg11[%56, %c0_30] : memref<32x512xf32, #tpu.memory_space<vmem>>, vector<8x512xf32>
    %c0_31 = arith.constant 0 : index
    %c0_32 = arith.constant 0 : index
    %58 = vector.load %arg3[%c0_31, %c0_32] : memref<128x512xf32, #tpu.memory_space<vmem>>, vector<128x512xf32>
    %cst_33 = arith.constant dense<0.000000e+00> : vector<8x512xf32>
    %59 = tpu.matmul %51, %58, %cst_33 {dimension_numbers = #tpu.dot_dimension_numbers<[1], [0], [0], [1], [0, 0, 1, 1], [], []>} : vector<8x128xf32>, vector<128x512xf32>, vector<8x512xf32> -> vector<8x512xf32>
    %60 = arith.addf %57, %59 : vector<8x512xf32>
    %61 = vector.extract_strided_slice %60 {offsets = [0, 0], sizes = [8, 128], strides = [1, 1]} : vector<8x512xf32> to vector<8x128xf32>
    %cst_34 = arith.constant 5.000000e-01 : f32
    %62 = vector.broadcast %cst_34 : f32 to vector<8x128xf32>
    %63 = arith.mulf %62, %61 : vector<8x128xf32>
    %64 = math.tanh %63 : vector<8x128xf32>
    %cst_35 = arith.constant 1.000000e+00 : f32
    %65 = vector.broadcast %cst_35 : f32 to vector<8x128xf32>
    %66 = arith.addf %64, %65 : vector<8x128xf32>
    %cst_36 = arith.constant 5.000000e-01 : f32
    %67 = vector.broadcast %cst_36 : f32 to vector<8x128xf32>
    %68 = arith.mulf %67, %66 : vector<8x128xf32>
    %69 = vector.extract_strided_slice %60 {offsets = [0, 128], sizes = [8, 128], strides = [1, 1]} : vector<8x512xf32> to vector<8x128xf32>
    %cst_37 = arith.constant 5.000000e-01 : f32
    %70 = vector.broadcast %cst_37 : f32 to vector<8x128xf32>
    %71 = arith.mulf %70, %69 : vector<8x128xf32>
    %72 = math.tanh %71 : vector<8x128xf32>
    %cst_38 = arith.constant 1.000000e+00 : f32
    %73 = vector.broadcast %cst_38 : f32 to vector<8x128xf32>
    %74 = arith.addf %72, %73 : vector<8x128xf32>
    %cst_39 = arith.constant 5.000000e-01 : f32
    %75 = vector.broadcast %cst_39 : f32 to vector<8x128xf32>
    %76 = arith.mulf %75, %74 : vector<8x128xf32>
    %77 = vector.extract_strided_slice %60 {offsets = [0, 256], sizes = [8, 128], strides = [1, 1]} : vector<8x512xf32> to vector<8x128xf32>
    %78 = math.tanh %77 : vector<8x128xf32>
    %79 = vector.extract_strided_slice %60 {offsets = [0, 384], sizes = [8, 128], strides = [1, 1]} : vector<8x512xf32> to vector<8x128xf32>
    %cst_40 = arith.constant 5.000000e-01 : f32
    %80 = vector.broadcast %cst_40 : f32 to vector<8x128xf32>
    %81 = arith.mulf %80, %79 : vector<8x128xf32>
    %82 = math.tanh %81 : vector<8x128xf32>
    %cst_41 = arith.constant 1.000000e+00 : f32
    %83 = vector.broadcast %cst_41 : f32 to vector<8x128xf32>
    %84 = arith.addf %82, %83 : vector<8x128xf32>
    %cst_42 = arith.constant 5.000000e-01 : f32
    %85 = vector.broadcast %cst_42 : f32 to vector<8x128xf32>
    %86 = arith.mulf %85, %84 : vector<8x128xf32>
    %87 = arith.mulf %76, %49 : vector<8x128xf32>
    %88 = arith.mulf %68, %78 : vector<8x128xf32>
    %89 = arith.addf %87, %88 : vector<8x128xf32>
    %90 = math.tanh %89 : vector<8x128xf32>
    %91 = arith.mulf %86, %90 : vector<8x128xf32>
    %92 = arith.index_cast %55 : i32 to index
    %c0_43 = arith.constant 0 : index
    %93 = vector.load %arg12[%92, %c0_43] : memref<32x128xf32, #tpu.memory_space<vmem>>, vector<8x128xf32>
    tpu.vector_store %arg12[%92, %c0_43], %91 {strides = array<i32>} : memref<32x128xf32, #tpu.memory_space<vmem>>, vector<8x128xf32>,
    %c2_i32 = arith.constant 2 : i32
    %c8_i32_44 = arith.constant 8 : i32
    %94 = arith.muli %c2_i32, %c8_i32_44 : i32
    %95 = tpu.assume_multiple %94, 8 : i32
    %96 = arith.index_cast %95 : i32 to index
    %c0_45 = arith.constant 0 : index
    %97 = vector.load %arg11[%96, %c0_45] : memref<32x512xf32, #tpu.memory_space<vmem>>, vector<8x512xf32>
    %c0_46 = arith.constant 0 : index
    %c0_47 = arith.constant 0 : index
    %98 = vector.load %arg3[%c0_46, %c0_47] : memref<128x512xf32, #tpu.memory_space<vmem>>, vector<128x512xf32>
    %cst_48 = arith.constant dense<0.000000e+00> : vector<8x512xf32>
    %99 = tpu.matmul %91, %98, %cst_48 {dimension_numbers = #tpu.dot_dimension_numbers<[1], [0], [0], [1], [0, 0, 1, 1], [], []>} : vector<8x128xf32>, vector<128x512xf32>, vector<8x512xf32> -> vector<8x512xf32>
    %100 = arith.addf %97, %99 : vector<8x512xf32>
    %101 = vector.extract_strided_slice %100 {offsets = [0, 0], sizes = [8, 128], strides = [1, 1]} : vector<8x512xf32> to vector<8x128xf32>
    %cst_49 = arith.constant 5.000000e-01 : f32
    %102 = vector.broadcast %cst_49 : f32 to vector<8x128xf32>
    %103 = arith.mulf %102, %101 : vector<8x128xf32>
    %104 = math.tanh %103 : vector<8x128xf32>
    %cst_50 = arith.constant 1.000000e+00 : f32
    %105 = vector.broadcast %cst_50 : f32 to vector<8x128xf32>
    %106 = arith.addf %104, %105 : vector<8x128xf32>
    %cst_51 = arith.constant 5.000000e-01 : f32
    %107 = vector.broadcast %cst_51 : f32 to vector<8x128xf32>
    %108 = arith.mulf %107, %106 : vector<8x128xf32>
    %109 = vector.extract_strided_slice %100 {offsets = [0, 128], sizes = [8, 128], strides = [1, 1]} : vector<8x512xf32> to vector<8x128xf32>
    %cst_52 = arith.constant 5.000000e-01 : f32
    %110 = vector.broadcast %cst_52 : f32 to vector<8x128xf32>
    %111 = arith.mulf %110, %109 : vector<8x128xf32>
    %112 = math.tanh %111 : vector<8x128xf32>
    %cst_53 = arith.constant 1.000000e+00 : f32
    %113 = vector.broadcast %cst_53 : f32 to vector<8x128xf32>
    %114 = arith.addf %112, %113 : vector<8x128xf32>
    %cst_54 = arith.constant 5.000000e-01 : f32
    %115 = vector.broadcast %cst_54 : f32 to vector<8x128xf32>
    %116 = arith.mulf %115, %114 : vector<8x128xf32>
    %117 = vector.extract_strided_slice %100 {offsets = [0, 256], sizes = [8, 128], strides = [1, 1]} : vector<8x512xf32> to vector<8x128xf32>
    %118 = math.tanh %117 : vector<8x128xf32>
    %119 = vector.extract_strided_slice %100 {offsets = [0, 384], sizes = [8, 128], strides = [1, 1]} : vector<8x512xf32> to vector<8x128xf32>
    %cst_55 = arith.constant 5.000000e-01 : f32
    %120 = vector.broadcast %cst_55 : f32 to vector<8x128xf32>
    %121 = arith.mulf %120, %119 : vector<8x128xf32>
    %122 = math.tanh %121 : vector<8x128xf32>
    %cst_56 = arith.constant 1.000000e+00 : f32
    %123 = vector.broadcast %cst_56 : f32 to vector<8x128xf32>
    %124 = arith.addf %122, %123 : vector<8x128xf32>
    %cst_57 = arith.constant 5.000000e-01 : f32
    %125 = vector.broadcast %cst_57 : f32 to vector<8x128xf32>
    %126 = arith.mulf %125, %124 : vector<8x128xf32>
    %127 = arith.mulf %116, %89 : vector<8x128xf32>
    %128 = arith.mulf %108, %118 : vector<8x128xf32>
    %129 = arith.addf %127, %128 : vector<8x128xf32>
    %130 = math.tanh %129 : vector<8x128xf32>
    %131 = arith.mulf %126, %130 : vector<8x128xf32>
    %132 = arith.index_cast %95 : i32 to index
    %c0_58 = arith.constant 0 : index
    %133 = vector.load %arg12[%132, %c0_58] : memref<32x128xf32, #tpu.memory_space<vmem>>, vector<8x128xf32>
    tpu.vector_store %arg12[%132, %c0_58], %131 {strides = array<i32>} : memref<32x128xf32, #tpu.memory_space<vmem>>, vector<8x128xf32>,
    %c3_i32 = arith.constant 3 : i32
    %c8_i32_59 = arith.constant 8 : i32
    %134 = arith.muli %c3_i32, %c8_i32_59 : i32
    %135 = tpu.assume_multiple %134, 8 : i32
    %136 = arith.index_cast %135 : i32 to index
    %c0_60 = arith.constant 0 : index
    %137 = vector.load %arg11[%136, %c0_60] : memref<32x512xf32, #tpu.memory_space<vmem>>, vector<8x512xf32>
    %c0_61 = arith.constant 0 : index
    %c0_62 = arith.constant 0 : index
    %138 = vector.load %arg3[%c0_61, %c0_62] : memref<128x512xf32, #tpu.memory_space<vmem>>, vector<128x512xf32>
    %cst_63 = arith.constant dense<0.000000e+00> : vector<8x512xf32>
    %139 = tpu.matmul %131, %138, %cst_63 {dimension_numbers = #tpu.dot_dimension_numbers<[1], [0], [0], [1], [0, 0, 1, 1], [], []>} : vector<8x128xf32>, vector<128x512xf32>, vector<8x512xf32> -> vector<8x512xf32>
    %140 = arith.addf %137, %139 : vector<8x512xf32>
    %141 = vector.extract_strided_slice %140 {offsets = [0, 0], sizes = [8, 128], strides = [1, 1]} : vector<8x512xf32> to vector<8x128xf32>
    %cst_64 = arith.constant 5.000000e-01 : f32
    %142 = vector.broadcast %cst_64 : f32 to vector<8x128xf32>
    %143 = arith.mulf %142, %141 : vector<8x128xf32>
    %144 = math.tanh %143 : vector<8x128xf32>
    %cst_65 = arith.constant 1.000000e+00 : f32
    %145 = vector.broadcast %cst_65 : f32 to vector<8x128xf32>
    %146 = arith.addf %144, %145 : vector<8x128xf32>
    %cst_66 = arith.constant 5.000000e-01 : f32
    %147 = vector.broadcast %cst_66 : f32 to vector<8x128xf32>
    %148 = arith.mulf %147, %146 : vector<8x128xf32>
    %149 = vector.extract_strided_slice %140 {offsets = [0, 128], sizes = [8, 128], strides = [1, 1]} : vector<8x512xf32> to vector<8x128xf32>
    %cst_67 = arith.constant 5.000000e-01 : f32
    %150 = vector.broadcast %cst_67 : f32 to vector<8x128xf32>
    %151 = arith.mulf %150, %149 : vector<8x128xf32>
    %152 = math.tanh %151 : vector<8x128xf32>
    %cst_68 = arith.constant 1.000000e+00 : f32
    %153 = vector.broadcast %cst_68 : f32 to vector<8x128xf32>
    %154 = arith.addf %152, %153 : vector<8x128xf32>
    %cst_69 = arith.constant 5.000000e-01 : f32
    %155 = vector.broadcast %cst_69 : f32 to vector<8x128xf32>
    %156 = arith.mulf %155, %154 : vector<8x128xf32>
    %157 = vector.extract_strided_slice %140 {offsets = [0, 256], sizes = [8, 128], strides = [1, 1]} : vector<8x512xf32> to vector<8x128xf32>
    %158 = math.tanh %157 : vector<8x128xf32>
    %159 = vector.extract_strided_slice %140 {offsets = [0, 384], sizes = [8, 128], strides = [1, 1]} : vector<8x512xf32> to vector<8x128xf32>
    %cst_70 = arith.constant 5.000000e-01 : f32
    %160 = vector.broadcast %cst_70 : f32 to vector<8x128xf32>
    %161 = arith.mulf %160, %159 : vector<8x128xf32>
    %162 = math.tanh %161 : vector<8x128xf32>
    %cst_71 = arith.constant 1.000000e+00 : f32
    %163 = vector.broadcast %cst_71 : f32 to vector<8x128xf32>
    %164 = arith.addf %162, %163 : vector<8x128xf32>
    %cst_72 = arith.constant 5.000000e-01 : f32
    %165 = vector.broadcast %cst_72 : f32 to vector<8x128xf32>
    %166 = arith.mulf %165, %164 : vector<8x128xf32>
    %167 = arith.mulf %156, %129 : vector<8x128xf32>
    %168 = arith.mulf %148, %158 : vector<8x128xf32>
    %169 = arith.addf %167, %168 : vector<8x128xf32>
    %170 = math.tanh %169 : vector<8x128xf32>
    %171 = arith.mulf %166, %170 : vector<8x128xf32>
    %172 = arith.index_cast %135 : i32 to index
    %c0_73 = arith.constant 0 : index
    %173 = vector.load %arg12[%172, %c0_73] : memref<32x128xf32, #tpu.memory_space<vmem>>, vector<8x128xf32>
    tpu.vector_store %arg12[%172, %c0_73], %171 {strides = array<i32>} : memref<32x128xf32, #tpu.memory_space<vmem>>, vector<8x128xf32>,
    %c4_i32 = arith.constant 4 : i32
    %c0_74 = arith.constant 0 : index
    %c0_75 = arith.constant 0 : index
    %c0_76 = arith.constant 0 : index
    %174 = vector.load %arg13[%c0_74, %c0_75, %c0_76] : memref<2x8x128xf32, #tpu.memory_space<vmem>>, vector<1x8x128xf32>
    %175 = vector.shape_cast %174 : vector<1x8x128xf32> to vector<8x128xf32>
    %176 = vector.shape_cast %171 : vector<8x128xf32> to vector<1x8x128xf32>
    tpu.vector_store %arg13[%c0_74, %c0_75, %c0_76], %176 {strides = array<i32>} : memref<2x8x128xf32, #tpu.memory_space<vmem>>, vector<1x8x128xf32>,
    %c0_77 = arith.constant 0 : index
    %c0_78 = arith.constant 0 : index
    %c0_79 = arith.constant 0 : index
    %177 = vector.load %arg14[%c0_77, %c0_78, %c0_79] : memref<2x8x128xf32, #tpu.memory_space<vmem>>, vector<1x8x128xf32>
    %178 = vector.shape_cast %177 : vector<1x8x128xf32> to vector<8x128xf32>
    %179 = vector.shape_cast %169 : vector<8x128xf32> to vector<1x8x128xf32>
    tpu.vector_store %arg14[%c0_77, %c0_78, %c0_79], %179 {strides = array<i32>} : memref<2x8x128xf32, #tpu.memory_space<vmem>>, vector<1x8x128xf32>,
    %c0_80 = arith.constant 0 : index
    %c0_81 = arith.constant 0 : index
    %180 = vector.load %arg12[%c0_80, %c0_81] : memref<32x128xf32, #tpu.memory_space<vmem>>, vector<32x128xf32>
    %c0_82 = arith.constant 0 : index
    %c0_83 = arith.constant 0 : index
    %181 = vector.load %arg5[%c0_82, %c0_83] : memref<128x512xf32, #tpu.memory_space<vmem>>, vector<128x512xf32>
    %cst_84 = arith.constant dense<0.000000e+00> : vector<32x512xf32>
    %182 = tpu.matmul %180, %181, %cst_84 {dimension_numbers = #tpu.dot_dimension_numbers<[1], [0], [0], [1], [0, 0, 1, 1], [], []>} : vector<32x128xf32>, vector<128x512xf32>, vector<32x512xf32> -> vector<32x512xf32>
    %c0_85 = arith.constant 0 : index
    %c0_86 = arith.constant 0 : index
    %183 = vector.load %arg7[%c0_85, %c0_86] : memref<1x512xf32, #tpu.memory_space<vmem>>, vector<1x512xf32>
    %184 = vector.broadcast %183 : vector<1x512xf32> to vector<32x512xf32>
    %185 = arith.addf %182, %184 : vector<32x512xf32>
    %c0_87 = arith.constant 0 : index
    %c0_88 = arith.constant 0 : index
    %186 = vector.load %arg11[%c0_87, %c0_88] : memref<32x512xf32, #tpu.memory_space<vmem>>, vector<32x512xf32>
    tpu.vector_store %arg11[%c0_87, %c0_88], %185 {strides = array<i32>} : memref<32x512xf32, #tpu.memory_space<vmem>>, vector<32x512xf32>,
    %c1 = arith.constant 1 : index
    %c0_89 = arith.constant 0 : index
    %c0_90 = arith.constant 0 : index
    %187 = vector.load %arg13[%c1, %c0_89, %c0_90] : memref<2x8x128xf32, #tpu.memory_space<vmem>>, vector<1x8x128xf32>
    %188 = vector.shape_cast %187 : vector<1x8x128xf32> to vector<8x128xf32>
    %c1_91 = arith.constant 1 : index
    %c0_92 = arith.constant 0 : index
    %c0_93 = arith.constant 0 : index
    %189 = vector.load %arg14[%c1_91, %c0_92, %c0_93] : memref<2x8x128xf32, #tpu.memory_space<vmem>>, vector<1x8x128xf32>
    %190 = vector.shape_cast %189 : vector<1x8x128xf32> to vector<8x128xf32>
    %c0_i32_94 = arith.constant 0 : i32
    %c8_i32_95 = arith.constant 8 : i32
    %191 = arith.muli %c0_i32_94, %c8_i32_95 : i32
    %192 = tpu.assume_multiple %191, 8 : i32
    %193 = arith.index_cast %192 : i32 to index
    %c0_96 = arith.constant 0 : index
    %194 = vector.load %arg11[%193, %c0_96] : memref<32x512xf32, #tpu.memory_space<vmem>>, vector<8x512xf32>
    %c0_97 = arith.constant 0 : index
    %c0_98 = arith.constant 0 : index
    %195 = vector.load %arg6[%c0_97, %c0_98] : memref<128x512xf32, #tpu.memory_space<vmem>>, vector<128x512xf32>
    %cst_99 = arith.constant dense<0.000000e+00> : vector<8x512xf32>
    %196 = tpu.matmul %188, %195, %cst_99 {dimension_numbers = #tpu.dot_dimension_numbers<[1], [0], [0], [1], [0, 0, 1, 1], [], []>} : vector<8x128xf32>, vector<128x512xf32>, vector<8x512xf32> -> vector<8x512xf32>
    %197 = arith.addf %194, %196 : vector<8x512xf32>
    %198 = vector.extract_strided_slice %197 {offsets = [0, 0], sizes = [8, 128], strides = [1, 1]} : vector<8x512xf32> to vector<8x128xf32>
    %cst_100 = arith.constant 5.000000e-01 : f32
    %199 = vector.broadcast %cst_100 : f32 to vector<8x128xf32>
    %200 = arith.mulf %199, %198 : vector<8x128xf32>
    %201 = math.tanh %200 : vector<8x128xf32>
    %cst_101 = arith.constant 1.000000e+00 : f32
    %202 = vector.broadcast %cst_101 : f32 to vector<8x128xf32>
    %203 = arith.addf %201, %202 : vector<8x128xf32>
    %cst_102 = arith.constant 5.000000e-01 : f32
    %204 = vector.broadcast %cst_102 : f32 to vector<8x128xf32>
    %205 = arith.mulf %204, %203 : vector<8x128xf32>
    %206 = vector.extract_strided_slice %197 {offsets = [0, 128], sizes = [8, 128], strides = [1, 1]} : vector<8x512xf32> to vector<8x128xf32>
    %cst_103 = arith.constant 5.000000e-01 : f32
    %207 = vector.broadcast %cst_103 : f32 to vector<8x128xf32>
    %208 = arith.mulf %207, %206 : vector<8x128xf32>
    %209 = math.tanh %208 : vector<8x128xf32>
    %cst_104 = arith.constant 1.000000e+00 : f32
    %210 = vector.broadcast %cst_104 : f32 to vector<8x128xf32>
    %211 = arith.addf %209, %210 : vector<8x128xf32>
    %cst_105 = arith.constant 5.000000e-01 : f32
    %212 = vector.broadcast %cst_105 : f32 to vector<8x128xf32>
    %213 = arith.mulf %212, %211 : vector<8x128xf32>
    %214 = vector.extract_strided_slice %197 {offsets = [0, 256], sizes = [8, 128], strides = [1, 1]} : vector<8x512xf32> to vector<8x128xf32>
    %215 = math.tanh %214 : vector<8x128xf32>
    %216 = vector.extract_strided_slice %197 {offsets = [0, 384], sizes = [8, 128], strides = [1, 1]} : vector<8x512xf32> to vector<8x128xf32>
    %cst_106 = arith.constant 5.000000e-01 : f32
    %217 = vector.broadcast %cst_106 : f32 to vector<8x128xf32>
    %218 = arith.mulf %217, %216 : vector<8x128xf32>
    %219 = math.tanh %218 : vector<8x128xf32>
    %cst_107 = arith.constant 1.000000e+00 : f32
    %220 = vector.broadcast %cst_107 : f32 to vector<8x128xf32>
    %221 = arith.addf %219, %220 : vector<8x128xf32>
    %cst_108 = arith.constant 5.000000e-01 : f32
    %222 = vector.broadcast %cst_108 : f32 to vector<8x128xf32>
    %223 = arith.mulf %222, %221 : vector<8x128xf32>
    %224 = arith.mulf %213, %190 : vector<8x128xf32>
    %225 = arith.mulf %205, %215 : vector<8x128xf32>
    %226 = arith.addf %224, %225 : vector<8x128xf32>
    %227 = math.tanh %226 : vector<8x128xf32>
    %228 = arith.mulf %223, %227 : vector<8x128xf32>
    %229 = arith.index_cast %192 : i32 to index
    %c0_109 = arith.constant 0 : index
    %230 = vector.load %arg12[%229, %c0_109] : memref<32x128xf32, #tpu.memory_space<vmem>>, vector<8x128xf32>
    tpu.vector_store %arg12[%229, %c0_109], %228 {strides = array<i32>} : memref<32x128xf32, #tpu.memory_space<vmem>>, vector<8x128xf32>,
    %c1_i32_110 = arith.constant 1 : i32
    %c8_i32_111 = arith.constant 8 : i32
    %231 = arith.muli %c1_i32_110, %c8_i32_111 : i32
    %232 = tpu.assume_multiple %231, 8 : i32
    %233 = arith.index_cast %232 : i32 to index
    %c0_112 = arith.constant 0 : index
    %234 = vector.load %arg11[%233, %c0_112] : memref<32x512xf32, #tpu.memory_space<vmem>>, vector<8x512xf32>
    %c0_113 = arith.constant 0 : index
    %c0_114 = arith.constant 0 : index
    %235 = vector.load %arg6[%c0_113, %c0_114] : memref<128x512xf32, #tpu.memory_space<vmem>>, vector<128x512xf32>
    %cst_115 = arith.constant dense<0.000000e+00> : vector<8x512xf32>
    %236 = tpu.matmul %228, %235, %cst_115 {dimension_numbers = #tpu.dot_dimension_numbers<[1], [0], [0], [1], [0, 0, 1, 1], [], []>} : vector<8x128xf32>, vector<128x512xf32>, vector<8x512xf32> -> vector<8x512xf32>
    %237 = arith.addf %234, %236 : vector<8x512xf32>
    %238 = vector.extract_strided_slice %237 {offsets = [0, 0], sizes = [8, 128], strides = [1, 1]} : vector<8x512xf32> to vector<8x128xf32>
    %cst_116 = arith.constant 5.000000e-01 : f32
    %239 = vector.broadcast %cst_116 : f32 to vector<8x128xf32>
    %240 = arith.mulf %239, %238 : vector<8x128xf32>
    %241 = math.tanh %240 : vector<8x128xf32>
    %cst_117 = arith.constant 1.000000e+00 : f32
    %242 = vector.broadcast %cst_117 : f32 to vector<8x128xf32>
    %243 = arith.addf %241, %242 : vector<8x128xf32>
    %cst_118 = arith.constant 5.000000e-01 : f32
    %244 = vector.broadcast %cst_118 : f32 to vector<8x128xf32>
    %245 = arith.mulf %244, %243 : vector<8x128xf32>
    %246 = vector.extract_strided_slice %237 {offsets = [0, 128], sizes = [8, 128], strides = [1, 1]} : vector<8x512xf32> to vector<8x128xf32>
    %cst_119 = arith.constant 5.000000e-01 : f32
    %247 = vector.broadcast %cst_119 : f32 to vector<8x128xf32>
    %248 = arith.mulf %247, %246 : vector<8x128xf32>
    %249 = math.tanh %248 : vector<8x128xf32>
    %cst_120 = arith.constant 1.000000e+00 : f32
    %250 = vector.broadcast %cst_120 : f32 to vector<8x128xf32>
    %251 = arith.addf %249, %250 : vector<8x128xf32>
    %cst_121 = arith.constant 5.000000e-01 : f32
    %252 = vector.broadcast %cst_121 : f32 to vector<8x128xf32>
    %253 = arith.mulf %252, %251 : vector<8x128xf32>
    %254 = vector.extract_strided_slice %237 {offsets = [0, 256], sizes = [8, 128], strides = [1, 1]} : vector<8x512xf32> to vector<8x128xf32>
    %255 = math.tanh %254 : vector<8x128xf32>
    %256 = vector.extract_strided_slice %237 {offsets = [0, 384], sizes = [8, 128], strides = [1, 1]} : vector<8x512xf32> to vector<8x128xf32>
    %cst_122 = arith.constant 5.000000e-01 : f32
    %257 = vector.broadcast %cst_122 : f32 to vector<8x128xf32>
    %258 = arith.mulf %257, %256 : vector<8x128xf32>
    %259 = math.tanh %258 : vector<8x128xf32>
    %cst_123 = arith.constant 1.000000e+00 : f32
    %260 = vector.broadcast %cst_123 : f32 to vector<8x128xf32>
    %261 = arith.addf %259, %260 : vector<8x128xf32>
    %cst_124 = arith.constant 5.000000e-01 : f32
    %262 = vector.broadcast %cst_124 : f32 to vector<8x128xf32>
    %263 = arith.mulf %262, %261 : vector<8x128xf32>
    %264 = arith.mulf %253, %226 : vector<8x128xf32>
    %265 = arith.mulf %245, %255 : vector<8x128xf32>
    %266 = arith.addf %264, %265 : vector<8x128xf32>
    %267 = math.tanh %266 : vector<8x128xf32>
    %268 = arith.mulf %263, %267 : vector<8x128xf32>
    %269 = arith.index_cast %232 : i32 to index
    %c0_125 = arith.constant 0 : index
    %270 = vector.load %arg12[%269, %c0_125] : memref<32x128xf32, #tpu.memory_space<vmem>>, vector<8x128xf32>
    tpu.vector_store %arg12[%269, %c0_125], %268 {strides = array<i32>} : memref<32x128xf32, #tpu.memory_space<vmem>>, vector<8x128xf32>,
    %c2_i32_126 = arith.constant 2 : i32
    %c8_i32_127 = arith.constant 8 : i32
    %271 = arith.muli %c2_i32_126, %c8_i32_127 : i32
    %272 = tpu.assume_multiple %271, 8 : i32
    %273 = arith.index_cast %272 : i32 to index
    %c0_128 = arith.constant 0 : index
    %274 = vector.load %arg11[%273, %c0_128] : memref<32x512xf32, #tpu.memory_space<vmem>>, vector<8x512xf32>
    %c0_129 = arith.constant 0 : index
    %c0_130 = arith.constant 0 : index
    %275 = vector.load %arg6[%c0_129, %c0_130] : memref<128x512xf32, #tpu.memory_space<vmem>>, vector<128x512xf32>
    %cst_131 = arith.constant dense<0.000000e+00> : vector<8x512xf32>
    %276 = tpu.matmul %268, %275, %cst_131 {dimension_numbers = #tpu.dot_dimension_numbers<[1], [0], [0], [1], [0, 0, 1, 1], [], []>} : vector<8x128xf32>, vector<128x512xf32>, vector<8x512xf32> -> vector<8x512xf32>
    %277 = arith.addf %274, %276 : vector<8x512xf32>
    %278 = vector.extract_strided_slice %277 {offsets = [0, 0], sizes = [8, 128], strides = [1, 1]} : vector<8x512xf32> to vector<8x128xf32>
    %cst_132 = arith.constant 5.000000e-01 : f32
    %279 = vector.broadcast %cst_132 : f32 to vector<8x128xf32>
    %280 = arith.mulf %279, %278 : vector<8x128xf32>
    %281 = math.tanh %280 : vector<8x128xf32>
    %cst_133 = arith.constant 1.000000e+00 : f32
    %282 = vector.broadcast %cst_133 : f32 to vector<8x128xf32>
    %283 = arith.addf %281, %282 : vector<8x128xf32>
    %cst_134 = arith.constant 5.000000e-01 : f32
    %284 = vector.broadcast %cst_134 : f32 to vector<8x128xf32>
    %285 = arith.mulf %284, %283 : vector<8x128xf32>
    %286 = vector.extract_strided_slice %277 {offsets = [0, 128], sizes = [8, 128], strides = [1, 1]} : vector<8x512xf32> to vector<8x128xf32>
    %cst_135 = arith.constant 5.000000e-01 : f32
    %287 = vector.broadcast %cst_135 : f32 to vector<8x128xf32>
    %288 = arith.mulf %287, %286 : vector<8x128xf32>
    %289 = math.tanh %288 : vector<8x128xf32>
    %cst_136 = arith.constant 1.000000e+00 : f32
    %290 = vector.broadcast %cst_136 : f32 to vector<8x128xf32>
    %291 = arith.addf %289, %290 : vector<8x128xf32>
    %cst_137 = arith.constant 5.000000e-01 : f32
    %292 = vector.broadcast %cst_137 : f32 to vector<8x128xf32>
    %293 = arith.mulf %292, %291 : vector<8x128xf32>
    %294 = vector.extract_strided_slice %277 {offsets = [0, 256], sizes = [8, 128], strides = [1, 1]} : vector<8x512xf32> to vector<8x128xf32>
    %295 = math.tanh %294 : vector<8x128xf32>
    %296 = vector.extract_strided_slice %277 {offsets = [0, 384], sizes = [8, 128], strides = [1, 1]} : vector<8x512xf32> to vector<8x128xf32>
    %cst_138 = arith.constant 5.000000e-01 : f32
    %297 = vector.broadcast %cst_138 : f32 to vector<8x128xf32>
    %298 = arith.mulf %297, %296 : vector<8x128xf32>
    %299 = math.tanh %298 : vector<8x128xf32>
    %cst_139 = arith.constant 1.000000e+00 : f32
    %300 = vector.broadcast %cst_139 : f32 to vector<8x128xf32>
    %301 = arith.addf %299, %300 : vector<8x128xf32>
    %cst_140 = arith.constant 5.000000e-01 : f32
    %302 = vector.broadcast %cst_140 : f32 to vector<8x128xf32>
    %303 = arith.mulf %302, %301 : vector<8x128xf32>
    %304 = arith.mulf %293, %266 : vector<8x128xf32>
    %305 = arith.mulf %285, %295 : vector<8x128xf32>
    %306 = arith.addf %304, %305 : vector<8x128xf32>
    %307 = math.tanh %306 : vector<8x128xf32>
    %308 = arith.mulf %303, %307 : vector<8x128xf32>
    %309 = arith.index_cast %272 : i32 to index
    %c0_141 = arith.constant 0 : index
    %310 = vector.load %arg12[%309, %c0_141] : memref<32x128xf32, #tpu.memory_space<vmem>>, vector<8x128xf32>
    tpu.vector_store %arg12[%309, %c0_141], %308 {strides = array<i32>} : memref<32x128xf32, #tpu.memory_space<vmem>>, vector<8x128xf32>,
    %c3_i32_142 = arith.constant 3 : i32
    %c8_i32_143 = arith.constant 8 : i32
    %311 = arith.muli %c3_i32_142, %c8_i32_143 : i32
    %312 = tpu.assume_multiple %311, 8 : i32
    %313 = arith.index_cast %312 : i32 to index
    %c0_144 = arith.constant 0 : index
    %314 = vector.load %arg11[%313, %c0_144] : memref<32x512xf32, #tpu.memory_space<vmem>>, vector<8x512xf32>
    %c0_145 = arith.constant 0 : index
    %c0_146 = arith.constant 0 : index
    %315 = vector.load %arg6[%c0_145, %c0_146] : memref<128x512xf32, #tpu.memory_space<vmem>>, vector<128x512xf32>
    %cst_147 = arith.constant dense<0.000000e+00> : vector<8x512xf32>
    %316 = tpu.matmul %308, %315, %cst_147 {dimension_numbers = #tpu.dot_dimension_numbers<[1], [0], [0], [1], [0, 0, 1, 1], [], []>} : vector<8x128xf32>, vector<128x512xf32>, vector<8x512xf32> -> vector<8x512xf32>
    %317 = arith.addf %314, %316 : vector<8x512xf32>
    %318 = vector.extract_strided_slice %317 {offsets = [0, 0], sizes = [8, 128], strides = [1, 1]} : vector<8x512xf32> to vector<8x128xf32>
    %cst_148 = arith.constant 5.000000e-01 : f32
    %319 = vector.broadcast %cst_148 : f32 to vector<8x128xf32>
    %320 = arith.mulf %319, %318 : vector<8x128xf32>
    %321 = math.tanh %320 : vector<8x128xf32>
    %cst_149 = arith.constant 1.000000e+00 : f32
    %322 = vector.broadcast %cst_149 : f32 to vector<8x128xf32>
    %323 = arith.addf %321, %322 : vector<8x128xf32>
    %cst_150 = arith.constant 5.000000e-01 : f32
    %324 = vector.broadcast %cst_150 : f32 to vector<8x128xf32>
    %325 = arith.mulf %324, %323 : vector<8x128xf32>
    %326 = vector.extract_strided_slice %317 {offsets = [0, 128], sizes = [8, 128], strides = [1, 1]} : vector<8x512xf32> to vector<8x128xf32>
    %cst_151 = arith.constant 5.000000e-01 : f32
    %327 = vector.broadcast %cst_151 : f32 to vector<8x128xf32>
    %328 = arith.mulf %327, %326 : vector<8x128xf32>
    %329 = math.tanh %328 : vector<8x128xf32>
    %cst_152 = arith.constant 1.000000e+00 : f32
    %330 = vector.broadcast %cst_152 : f32 to vector<8x128xf32>
    %331 = arith.addf %329, %330 : vector<8x128xf32>
    %cst_153 = arith.constant 5.000000e-01 : f32
    %332 = vector.broadcast %cst_153 : f32 to vector<8x128xf32>
    %333 = arith.mulf %332, %331 : vector<8x128xf32>
    %334 = vector.extract_strided_slice %317 {offsets = [0, 256], sizes = [8, 128], strides = [1, 1]} : vector<8x512xf32> to vector<8x128xf32>
    %335 = math.tanh %334 : vector<8x128xf32>
    %336 = vector.extract_strided_slice %317 {offsets = [0, 384], sizes = [8, 128], strides = [1, 1]} : vector<8x512xf32> to vector<8x128xf32>
    %cst_154 = arith.constant 5.000000e-01 : f32
    %337 = vector.broadcast %cst_154 : f32 to vector<8x128xf32>
    %338 = arith.mulf %337, %336 : vector<8x128xf32>
    %339 = math.tanh %338 : vector<8x128xf32>
    %cst_155 = arith.constant 1.000000e+00 : f32
    %340 = vector.broadcast %cst_155 : f32 to vector<8x128xf32>
    %341 = arith.addf %339, %340 : vector<8x128xf32>
    %cst_156 = arith.constant 5.000000e-01 : f32
    %342 = vector.broadcast %cst_156 : f32 to vector<8x128xf32>
    %343 = arith.mulf %342, %341 : vector<8x128xf32>
    %344 = arith.mulf %333, %306 : vector<8x128xf32>
    %345 = arith.mulf %325, %335 : vector<8x128xf32>
    %346 = arith.addf %344, %345 : vector<8x128xf32>
    %347 = math.tanh %346 : vector<8x128xf32>
    %348 = arith.mulf %343, %347 : vector<8x128xf32>
    %349 = arith.index_cast %312 : i32 to index
    %c0_157 = arith.constant 0 : index
    %350 = vector.load %arg12[%349, %c0_157] : memref<32x128xf32, #tpu.memory_space<vmem>>, vector<8x128xf32>
    tpu.vector_store %arg12[%349, %c0_157], %348 {strides = array<i32>} : memref<32x128xf32, #tpu.memory_space<vmem>>, vector<8x128xf32>,
    %c4_i32_158 = arith.constant 4 : i32
    %c1_159 = arith.constant 1 : index
    %c0_160 = arith.constant 0 : index
    %c0_161 = arith.constant 0 : index
    %351 = vector.load %arg13[%c1_159, %c0_160, %c0_161] : memref<2x8x128xf32, #tpu.memory_space<vmem>>, vector<1x8x128xf32>
    %352 = vector.shape_cast %351 : vector<1x8x128xf32> to vector<8x128xf32>
    %353 = vector.shape_cast %348 : vector<8x128xf32> to vector<1x8x128xf32>
    tpu.vector_store %arg13[%c1_159, %c0_160, %c0_161], %353 {strides = array<i32>} : memref<2x8x128xf32, #tpu.memory_space<vmem>>, vector<1x8x128xf32>,
    %c1_162 = arith.constant 1 : index
    %c0_163 = arith.constant 0 : index
    %c0_164 = arith.constant 0 : index
    %354 = vector.load %arg14[%c1_162, %c0_163, %c0_164] : memref<2x8x128xf32, #tpu.memory_space<vmem>>, vector<1x8x128xf32>
    %355 = vector.shape_cast %354 : vector<1x8x128xf32> to vector<8x128xf32>
    %356 = vector.shape_cast %346 : vector<8x128xf32> to vector<1x8x128xf32>
    tpu.vector_store %arg14[%c1_162, %c0_163, %c0_164], %356 {strides = array<i32>} : memref<2x8x128xf32, #tpu.memory_space<vmem>>, vector<1x8x128xf32>,
    %c0_165 = arith.constant 0 : index
    %c0_166 = arith.constant 0 : index
    %357 = vector.load %arg12[%c0_165, %c0_166] : memref<32x128xf32, #tpu.memory_space<vmem>>, vector<32x128xf32>
    %c0_167 = arith.constant 0 : index
    %c0_168 = arith.constant 0 : index
    %358 = vector.load %arg8[%c0_167, %c0_168] : memref<128x128xf32, #tpu.memory_space<vmem>>, vector<128x128xf32>
    %cst_169 = arith.constant dense<0.000000e+00> : vector<32x128xf32>
    %359 = tpu.matmul %357, %358, %cst_169 {dimension_numbers = #tpu.dot_dimension_numbers<[1], [0], [0], [1], [0, 0, 1, 1], [], []>} : vector<32x128xf32>, vector<128x128xf32>, vector<32x128xf32> -> vector<32x128xf32>
    %c0_170 = arith.constant 0 : index
    %c0_171 = arith.constant 0 : index
    %360 = vector.load %arg9[%c0_170, %c0_171] : memref<1x128xf32, #tpu.memory_space<vmem>>, vector<1x128xf32>
    %361 = vector.broadcast %360 : vector<1x128xf32> to vector<32x128xf32>
    %362 = arith.addf %359, %361 : vector<32x128xf32>
    %c0_172 = arith.constant 0 : index
    %c0_173 = arith.constant 0 : index
    %363 = vector.load %arg10[%c0_172, %c0_173] : memref<32x128xf32, #tpu.memory_space<vmem>>, vector<32x128xf32>
    tpu.vector_store %arg10[%c0_172, %c0_173], %362 {strides = array<i32>} : memref<32x128xf32, #tpu.memory_space<vmem>>, vector<32x128xf32>,
    return
  }
  func.func @transform_0(%arg0: i32) -> (i32, i32) {
    %c0_i32 = arith.constant 0 : i32
    %c0_i32_0 = arith.constant 0 : i32
    return %arg0, %c0_i32 : i32, i32
  }
  func.func @transform_1(%arg0: i32) -> (i32, i32) {
    %c0_i32 = arith.constant 0 : i32
    %c0_i32_0 = arith.constant 0 : i32
    %c0_i32_1 = arith.constant 0 : i32
    return %c0_i32, %c0_i32_0 : i32, i32
  }
  func.func @transform_2(%arg0: i32) -> (i32, i32) {
    %c0_i32 = arith.constant 0 : i32
    %c0_i32_0 = arith.constant 0 : i32
    %c0_i32_1 = arith.constant 0 : i32
    return %c0_i32, %c0_i32_0 : i32, i32
  }
  func.func @transform_3(%arg0: i32) -> (i32, i32) {
    %c0_i32 = arith.constant 0 : i32
    %c0_i32_0 = arith.constant 0 : i32
    %c0_i32_1 = arith.constant 0 : i32
    return %c0_i32, %c0_i32_0 : i32, i32
  }
  func.func @transform_4(%arg0: i32) -> (i32, i32) {
    %c0_i32 = arith.constant 0 : i32
    %c0_i32_0 = arith.constant 0 : i32
    %c0_i32_1 = arith.constant 0 : i32
    return %c0_i32, %c0_i32_0 : i32, i32
  }
  func.func @transform_5(%arg0: i32) -> (i32, i32) {
    %c0_i32 = arith.constant 0 : i32
    %c0_i32_0 = arith.constant 0 : i32
    %c0_i32_1 = arith.constant 0 : i32
    return %c0_i32, %c0_i32_0 : i32, i32
  }
  func.func @transform_6(%arg0: i32) -> (i32, i32) {
    %c0_i32 = arith.constant 0 : i32
    %c0_i32_0 = arith.constant 0 : i32
    %c0_i32_1 = arith.constant 0 : i32
    return %c0_i32, %c0_i32_0 : i32, i32
  }
  func.func @transform_7(%arg0: i32) -> (i32, i32) {
    %c0_i32 = arith.constant 0 : i32
    %c0_i32_0 = arith.constant 0 : i32
    %c0_i32_1 = arith.constant 0 : i32
    return %c0_i32, %c0_i32_0 : i32, i32
  }
  func.func @transform_8(%arg0: i32) -> (i32, i32) {
    %c0_i32 = arith.constant 0 : i32
    %c0_i32_0 = arith.constant 0 : i32
    %c0_i32_1 = arith.constant 0 : i32
    return %c0_i32, %c0_i32_0 : i32, i32
  }
  func.func @transform_9(%arg0: i32) -> (i32, i32) {
    %c0_i32 = arith.constant 0 : i32
    %c0_i32_0 = arith.constant 0 : i32
    return %arg0, %c0_i32 : i32, i32
  }
}

</mosaic_0001>

<bundles_post_ra>
// kernel: tpu_custom_call.1
= control target key start
LH: loop header
LB: loop body
LE: loop exit
PB: predicated region body
PF: predicated region fallthrough
CT: control target
= control target key end

     0   :  { %s3901_s0 = inlined_call_operand.vmem [shape: f32[64,16], index: 0, kind: input, shape index: {}]   ;;  %s3902_s1 = inlined_call_operand.vmem [shape: f32[16,512], index: 1, kind: input, shape index: {}]   ;;  %s3903_s2 = inlined_call_operand.hbm [shape: f32[128,512], index: 2, kind: input, shape index: {}]   ;;  %s3904_s3 = inlined_call_operand.vmem [shape: f32[1,512], index: 3, kind: input, shape index: {}]   ;;  %s3905_s4 = inlined_call_operand.hbm [shape: f32[128,512], index: 4, kind: input, shape index: {}]   ;;  %s3906_s5 = inlined_call_operand.hbm [shape: f32[128,512], index: 5, kind: input, shape index: {}]   ;;  %s3907_s6 = inlined_call_operand.vmem [shape: f32[1,512], index: 6, kind: input, shape index: {}]   ;;  %s3908_s7 = inlined_call_operand.hbm [shape: f32[128,128], index: 7, kind: input, shape index: {}]   ;;  %s3909_s8 = inlined_call_operand.vmem [shape: f32[1,128], index: 8, kind: input, shape index: {}]   ;;  %s3910_s9 = inlined_call_operand.hbm [shape: f32[64,128], index: 9, kind: output, shape index: {}]  }
   0x1   :  { %3934 = sst [smem:[#allocation31_spill]] %s3903_s2 }
   0x2   :  { %3935 = sst [smem:[#allocation32_spill]] %s3905_s4 }
   0x3   :  { %14 = vsyncpa [#allocation7], 0 }
   0x4   :  { %15 = vsyncpa [#allocation10], 0 }
   0x5   :  { %16 = vsyncpa [#allocation13], 0 }
   0x6   :  { %17 = vsyncpa [#allocation8], 0 }
   0x7   :  { %19 = vsyncpa [#allocation8 + $0x1], 0  ;;  %s2821_s30 = smov 0   ;;  %s2823_s10 = smov 0  }
   0x8   :  { %s2825_s11 = smov 0   ;;  %s2827_s12 = smov 0  }
   0x9 LB: > { %3936 = sst [smem:[#allocation19_spill]] %s2754_s11  ;;  %s2842_s13 = sadd.s32 4294967295, %s2758_s12   ;;  %s2758_s12 = sphi %s2827_s12, %s3970_s12   ;;  %s2754_s11 = sphi %s2825_s11, %s3972_s11   ;;  %s2750_s10 = sphi %s2823_s10, %s3974_s10   ;;  %s2746_s30 = sphi %s2821_s30, %s3973_s30  }
   0xa   : > { %s2358_s14 = sadd.s32 4294967294, %s2758_s12   ;;  %s2846_s15 = sadd.s32 1, %s2758_s12  }
   0xb   : > { %3937 = sst [smem:[#allocation20_spill]] %s2846_s15  ;;  %s226_s16 = sadd.s32 1, %s2754_s11 }
   0xc   : > { %s223_s17 = ssub.s32 %s2758_s12, %s2846_s15  ;;  %p236_p0 = scmp.ne.s32.totalorder %s2754_s11, %s2750_s10 }
   0xd   : > { %p224_p1 = scmp.eq.s32.totalorder %s223_s17, 0  ;;  %p237_p2 = scmp.eq.s32.totalorder %s2842_s13, 1 }
   0xe   : > { %p242_p3 = scmp.ne.s32.totalorder %s2750_s10, %s2746_s30  ;;  %p243_p4 = scmp.eq.s32.totalorder %s2358_s14, 1 }
   0xf   : > { %s2857_s18 = scalar_select %p224_p1, %s2754_s11, %s226_s16  }
  0x10   : > { %p2859_p5 = por %p237_p2, %p236_p0  ;;  %p2863_p6 = por %p243_p4, %p242_p3 }
  0x11   : > { %3938 = sst [smem:[#allocation21_spill]] %s2857_s18  ;;  %p2359_p7 = scmp.ge.s32.totalorder %s2758_s12, 1 }
  0x12   : > { %p250_p8 = scmp.lt.s32.totalorder %s2758_s12, 3  ;;  %p2360_p9 = scmp.ne.s32.totalorder %s2842_s13, 0 }
  0x13   : > { %p2431_p10 = scmp.eq.s32.totalorder %s2842_s13, 0  ;;  %s3942_s4 = sld [smem:[#allocation32_spill]] }
  0x14   : > { %p2871_p11 = pnand %p2359_p7, %p250_p8  ;;  %s3943_s2 = sld [smem:[#allocation31_spill]] }
  0x15   : > { %s2760_s29 = smov [#allocation9]   ;;  %s2761_s16 = smov 512  }
  0x16   : > { %p2414_p12 = pneg %p2871_p11  ;;  %s283_s14 = sshll.u32 %s2760_s29, 4  ;;  %s284_s14 = int_to_ptr.vmem [resolvable:$true] %s283_s14 }
  0x17   : > { %s2762_s17 = smov 32   ;;  %s2763_s22 = smov [#allocation6]  }
  0x18   : > { %p2885_p13 = pnand %p2431_p10, %p2414_p12  ;;  %s266_s23 = sshll.u32 %s2763_s22, 4  ;;  %s267_s23 = int_to_ptr.vmem [resolvable:$true] %s266_s23 }
  0x19   : > { %s281_s24 = sshll.u32 %s3942_s4, 4  ;;  %s312_s18 = sshll.u32 %s3908_s7, 4  ;;  %s282_s24 = int_to_ptr.hbm [resolvable:$true] %s281_s24  ;;  %s313_s18 = int_to_ptr.hbm [resolvable:$true] %s312_s18 }
  0x1a   : > { %s264_s27 = sshll.u32 %s3943_s2, 4  ;;  %s295_s2 = sshll.u32 %s3906_s5, 4  ;;  %s265_s27 = int_to_ptr.hbm [resolvable:$true] %s264_s27  ;;  %s296_s2 = int_to_ptr.hbm [resolvable:$true] %s295_s2 }
  0x1b   : > { %2420 = dma.hbm_to_vmem [thread:$0]  (!%p2885_p13), %s282_s24, 8192, %s284_s14, [#allocation10], %s2761_s16, %s2761_s16, %s2762_s17  }
  0x1c   : > { %2417 = dma.hbm_to_vmem [thread:$0]  (!%p2885_p13), %s265_s27, 8192, %s267_s23, [#allocation7], %s2761_s16, %s2761_s16, %s2762_s17  }
  0x1d   : > { %s2764_s11 = smov [#allocation11]   ;;  %s2765_s24 = smov [#allocation12]  }
  0x1e   : > { %s297_s15 = sshll.u32 %s2764_s11, 4  ;;  %s314_s14 = sshll.u32 %s2765_s24, 4  ;;  %s298_s15 = int_to_ptr.vmem [resolvable:$true] %s297_s15  ;;  %s315_s14 = int_to_ptr.vmem [resolvable:$true] %s314_s14 }
  0x1f   : > { %2423 = dma.hbm_to_vmem [thread:$0]  (!%p2885_p13), %s296_s2, 8192, %s298_s15, [#allocation10], %s2761_s16, %s2761_s16, %s2762_s17  }
  0x20   : > { %s2766_s22 = smov 128   ;;  %s2767_s25 = smov 8  }
  0x21   : > { %2426 = dma.hbm_to_vmem [thread:$0]  (!%p2885_p13), %s313_s18, 2048, %s315_s14, [#allocation13], %s2766_s22, %s2766_s22, %s2767_s25  }
  0x22   : > { %342 = sbr.rel (%p2871_p11) target bundleno = 1504 (0x5e0), region = 56 }
  0x27   : > { %2729 = dma.done.wait (%p2431_p10), [#allocation7], 8192  }
  0x28   : > { %2731 = vsyncadd (%p2431_p10), [#allocation7], 4294959104 }
  0x29   : > { %2733 = dma.done.wait (%p2431_p10), [#allocation10], 16384  }
  0x2a   : > { %2735 = vsyncadd (%p2431_p10), [#allocation10], 4294950912 }
  0x2b   : > { %2737 = dma.done.wait (%p2431_p10), [#allocation13], 2048  }
  0x2c   : > { %2739 = vsyncadd (%p2431_p10), [#allocation13], 4294965248  ;;  %s391_s2 = sand.u32 1, %s2750_s10   ;;  %s2371_s4 = sshll.u32 %s2842_s13, 2 }
  0x2d   : > { %s2370_s11 = sshll.u32 %s391_s2, 5  ;;  %p395_p0 = scmp.lt.s32.totalorder %s2371_s4, 7 }
  0x2e   : > { %s2926_s28 = scalar_lea.vmem [#allocation14], %s2370_s11  ;;  %404 = sbr.rel (%p2360_p9) target bundleno = 56 (0x38), region = 76 }
  0x2f   : > { %s3976_s4 = smov (!%p395_p0, %s2371_s4), 7 }
  0x30   : > { %s2372_s15 = sshll.u32 %s3976_s4, 3 }
  0x31   : > { %s2924_s27 = scalar_lea.vmem %s3901_s0, %s2372_s15 }
  0x33   : > { %v2768_v0 = vmov 0.0  }
  0x34   : > { %405 = vst [vmem:[#allocation4] sm:$0xff] %v2768_v0 }
  0x35   : > { %406 = vst [vmem:[#allocation4 + $0x8] sm:$0xff] %v2768_v0 }
  0x36   : > { %407 = vst [vmem:[#allocation5 + $0x8] sm:$0xff] %v2768_v0 }
  0x37   : > { %408 = vst [vmem:[#allocation5] sm:$0xff] %v2768_v0 }
  0x38 PF: > { %v418_v1 = vld [vmem:[%s3902_s1 + $0x28] sm:$0xff]  ;;  %v419_v2 = vld [vmem:[%s3902_s1 + $0x30] sm:$0xff]  ;;  %v2943_v5 = vld [vmem:[%s2924_s27] sm:$0xff]  ;;  %vm431_vm0 = vcmask 130048   ;;  %s2395_s22 = sshll.u32 %s2842_s13, 5  ;;  %s2249_s15 = sshll.u32 %s2926_s28, 4  ;;  %s2250_s15 = int_to_ptr.vmem [resolvable:$true] %s2249_s15 }
  0x39   : > { %v414_v3 = vld [vmem:[%s3902_s1 + $0x8] sm:$0xff]  ;;  %487 = vmatpush.msra.mxu1 %v418_v1  ;;  %516 = vmatpush.msra.mxu2 %v419_v2  ;;  %v415_v4 = vld [vmem:[%s3902_s1 + $0x10] sm:$0xff]  ;;  %v2945_v6 = vld [vmem:[#allocation6 + $0x1e0] sm:$0xff]  ;;  %s2248_s11 = scalar_lea.hbm %s3910_s9, %s2395_s22  ;;  %s2237_s21 = scalar_lea.sflag [#allocation8], %s391_s2 }
  0x3a   : > { %v2947_v7 = vld [vmem:[#allocation6 + $0x1f0] sm:$0xff]  ;;  %v420_v8 = vld [vmem:[%s3902_s1 + $0x38] sm:$0xff]  ;;  %v2956_v9 = vld [vmem:[#allocation6 + $0x1c0] sm:$0xff]  ;;  %s2251_s18 = sshll.u32 %s2248_s11, 4  ;;  %s2704_s23 = scalar_lea.hbm %s3910_s9, 64  ;;  %s2252_s18 = int_to_ptr.hbm [resolvable:$true] %s2251_s18 }
  0x3b   : > { %488 = vmatpush.msra.mxu1 %v414_v3  ;;  %517 = vmatpush.msra.mxu2 %v415_v4  ;;  %v2958_v10 = vld [vmem:[#allocation6 + $0x1d0] sm:$0xff]  ;;  %v416_v11 = vld [vmem:[%s3902_s1 + $0x18] sm:$0xff]  ;;  %v2965_v12 = vld [vmem:[#allocation6 + $0x1a0] sm:$0xff]  ;;  %s2698_s16 = sshra.s32 %s2252_s18, 4  ;;  %s2699_s16 = int_to_ptr.hbm [resolvable:$true] %s2698_s16 }
  0x3c   : > { %2378 = vmatmul.msk.f32.vlgmr.msra.gmra.mxu1 %vm431_vm0, %v2943_v5  ;;  %2382 = vmatmul.msk.f32.vlgmr.msra.gmra.mxu2 %vm431_vm0, %v2943_v5  ;;  %v2969_v13 = vld [vmem:[#allocation6 + $0x1b0] sm:$0xff]  ;;  %v2971_v14 = vld [vmem:[#allocation6 + $0x1f8] sm:$0xff]  ;;  %v2973_v15 = vld [vmem:[#allocation6 + $0x180] sm:$0xff]  ;;  %s2700_s17 = scalar_lea.hbm %s2699_s16, 32  ;;  %p2705_p4 = scmp.lt.s32.totalorder %s2699_s16, %s3910_s9 }
  0x3d   : > { %649 = vmatpush.msrb.mxu1 %v2945_v6  ;;  %689 = vmatpush.msrb.mxu2 %v2947_v7  ;;  %v2978_v16 = vld [vmem:[#allocation6 + $0x190] sm:$0xff]  ;;  %v2981_v17 = vld [vmem:[%s2924_s27 + $0x8] sm:$0xff]  ;;  %v2985_v18 = vld [vmem:[#allocation6 + $0x160] sm:$0xff]  ;;  %p2701_p1 = scmp.ne.s32.totalorder %s2699_s16, %s2700_s17  ;;  %p2706_p7 = scmp.lt.s32.totalorder %s2704_s23, %s2700_s17 }
  0x3e   : > { %545 = vmatpush.msra.mxu3 %v420_v8  ;;  %v2988_v19 = vld [vmem:[#allocation6 + $0x1d8] sm:$0xff]  ;;  %v2990_v20 = vld [vmem:[#allocation6 + $0x170] sm:$0xff]  ;;  %v2995_v21 = vld [vmem:[#allocation6 + $0x140] sm:$0xff] }
  0x3f   : > { %650 = vmatpush.msrb.mxu1 %v2956_v9  ;;  %690 = vmatpush.msrb.mxu2 %v2958_v10  ;;  %v3000_v22 = vld [vmem:[#allocation6 + $0x1b8] sm:$0xff]  ;;  %v3002_v23 = vld [vmem:[#allocation6 + $0x150] sm:$0xff]  ;;  %v3006_v24 = vld [vmem:[#allocation6 + $0x120] sm:$0xff]  ;;  %p2702_p2 = pnand %p2701_p1, %p2859_p5  ;;  %p2707_p8 = por %p2706_p7, %p2705_p4 }
  0x40   : > { %546 = vmatpush.msra.mxu3 %v416_v11  ;;  %v3009_v25 = vld [vmem:[#allocation6 + $0x198] sm:$0xff]  ;;  %v3011_v26 = vld [vmem:[#allocation6 + $0x130] sm:$0xff]  ;;  %v3015_v27 = vld [vmem:[#allocation6 + $0x100] sm:$0xff] }
  0x41   : > { %651 = vmatpush.msrb.mxu1 %v2965_v12  ;;  %2386 = vmatmul.msk.f32.vlgmr.msra.gmra.mxu3 %vm431_vm0, %v2943_v5  ;;  %v417_v28 = vld [vmem:[%s3902_s1 + $0x20] sm:$0xff]  ;;  %v3023_v29 = vld [vmem:[#allocation6 + $0x178] sm:$0xff]  ;;  %v3025_v30 = vld [vmem:[#allocation6 + $0x110] sm:$0xff]  ;;  %p2703_p3 = pneg %p2702_p2 }
  0x42   : > { %691 = vmatpush.msrb.mxu2 %v2969_v13  ;;  %709 = vmatpush.msrb.mxu3 %v2971_v14  ;;  %v3030_v31 = vld [vmem:[%s2924_s27 + $0x10] sm:$0xff]  ;;  %v3033_v32 = vld [vmem:[#allocation6 + $0xe0] sm:$0xff]  ;;  %v3035_v33 = vld [vmem:[#allocation6 + $0x158] sm:$0xff] }
  0x43   : > { %652 = vmatpush.msrb.mxu1 %v2973_v15  ;;  %458 = vmatpush.msra.mxu0 %v417_v28  ;;  %v3039_v34 = vld [vmem:[#allocation6 + $0xf0] sm:$0xff]  ;;  %v413_v35 = vld [vmem:[%s3902_s1] sm:$0xff]  ;;  %v3050_v37 = vld [vmem:[#allocation6 + $0x138] sm:$0xff]  ;;  %p2708_p9 = pnand %p2707_p8, %p2703_p3 }
  0x44   : > { %692 = vmatpush.msrb.mxu2 %v2978_v16  ;;  %2379 = vmatmul.msk.f32.gmra.mxu1 %vm431_vm0, %v2981_v17  ;;  %3945 = vst [vmem:[#allocation22_spill] sm:$0xff] %v3039_v34  ;;  %v3048_v36 = vld [vmem:[#allocation6 + $0xc0] sm:$0xff]  ;;  %v3054_v38 = vld [vmem:[#allocation6 + $0xd0] sm:$0xff]  ;;  %v3059_v40 = vld [vmem:[#allocation6 + $0x118] sm:$0xff] }
  0x45   : > { %2383 = vmatmul.msk.f32.gmra.mxu2 %vm431_vm0, %v2981_v17  ;;  %653 = vmatpush.msrb.mxu1 %v2985_v18  ;;  %3946 = vst [vmem:[#allocation23_spill] sm:$0xff] %v3054_v38  ;;  %v3057_v39 = vld [vmem:[#allocation6 + $0xa0] sm:$0xff]  ;;  %v3063_v41 = vld [vmem:[#allocation6 + $0xb0] sm:$0xff]  ;;  %v3070_v43 = vld [vmem:[#allocation6 + $0xf8] sm:$0xff] }
  0x46   : > { %710 = vmatpush.msrb.mxu3 %v2988_v19  ;;  %693 = vmatpush.msrb.mxu2 %v2990_v20  ;;  %v3068_v42 = vld [vmem:[#allocation6 + $0x80] sm:$0xff]  ;;  %v3074_v44 = vld [vmem:[#allocation6 + $0x90] sm:$0xff]  ;;  %v3077_v45 = vld [vmem:[%s2924_s27 + $0x18] sm:$0xff] }
  0x47   : > { %654 = vmatpush.msrb.mxu1 %v2995_v21  ;;  %459 = vmatpush.msra.mxu0 %v413_v35  ;;  %v3080_v46 = vld [vmem:[#allocation6 + $0x60] sm:$0xff]  ;;  %v3086_v47 = vld [vmem:[#allocation6 + $0xd8] sm:$0xff]  ;;  %v3088_v48 = vld [vmem:[#allocation6 + $0x70] sm:$0xff] }
  0x48   : > { %711 = vmatpush.msrb.mxu3 %v3000_v22  ;;  %694 = vmatpush.msrb.mxu2 %v3002_v23  ;;  %v3093_v49 = vld [vmem:[#allocation6 + $0x40] sm:$0xff]  ;;  %v3098_v50 = vld [vmem:[#allocation6 + $0xb8] sm:$0xff]  ;;  %v3100_v51 = vld [vmem:[#allocation6 + $0x50] sm:$0xff] }
  0x49   : > { %655 = vmatpush.msrb.mxu1 %v3006_v24  ;;  %2387 = vmatmul.msk.f32.gmra.mxu3 %vm431_vm0, %v2981_v17  ;;  %v3104_v52 = vld [vmem:[#allocation6 + $0x20] sm:$0xff]  ;;  %v3107_v53 = vld [vmem:[#allocation6 + $0x98] sm:$0xff]  ;;  %v3109_v54 = vld [vmem:[#allocation6 + $0x30] sm:$0xff] }
  0x4a   : > { %712 = vmatpush.msrb.mxu3 %v3009_v25  ;;  %695 = vmatpush.msrb.mxu2 %v3011_v26  ;;  %v3114_v55 = vld [vmem:[#allocation6] sm:$0xff]  ;;  %v3119_v56 = vld [vmem:[#allocation6 + $0x78] sm:$0xff]  ;;  %v3121_v57 = vld [vmem:[#allocation6 + $0x1e8] sm:$0xff] }
  0x4b   : > { %656 = vmatpush.msrb.mxu1 %v3015_v27  ;;  %2374 = vmatmul.msk.f32.vlgmr.msra.gmra.mxu0 %vm431_vm0, %v2943_v5  ;;  %v3125_v58 = vld [vmem:[#allocation6 + $0x10] sm:$0xff]  ;;  %v3127_v59 = vld [vmem:[#allocation4] sm:$0xff]  ;;  %v3130_v60 = vld [vmem:[#allocation6 + $0x58] sm:$0xff] }
  0x4c   : > { %713 = vmatpush.msrb.mxu3 %v3023_v29  ;;  %696 = vmatpush.msrb.mxu2 %v3025_v30  ;;  %v3135_v61 = vld [vmem:[#allocation6 + $0x1c8] sm:$0xff]  ;;  %v3139_v62 = vld [vmem:[#allocation6 + $0x38] sm:$0xff] }
  0x4d   : > { %2380 = vmatmul.msk.f32.gmra.mxu1 %vm431_vm0, %v3030_v31  ;;  %2384 = vmatmul.msk.f32.gmra.mxu2 %vm431_vm0, %v3030_v31  ;;  %v3143_v63 = vld [vmem:[#allocation6 + $0x1a8] sm:$0xff]  ;;  %v3146_v0 = vld [vmem:[#allocation6 + $0x18] sm:$0xff] }
  0x4e   : > { %657 = vmatpush.msrb.mxu1 %v3033_v32  ;;  %714 = vmatpush.msrb.mxu3 %v3035_v33  ;;  %v3150_v1 = vld [vmem:[#allocation6 + $0x188] sm:$0xff] }
  0x4f   : > { %697 = vmatpush.msrb.mxu2 %v3039_v34  ;;  %823 = vmatpush.msrb.mxu0 %v2945_v6  ;;  %v3156_v2 = vld [vmem:[#allocation6 + $0x168] sm:$0xff] }
  0x50   : > { %658 = vmatpush.msrb.mxu1 %v3048_v36  ;;  %715 = vmatpush.msrb.mxu3 %v3050_v37  ;;  %v3161_v3 = vld [vmem:[#allocation6 + $0x148] sm:$0xff] }
  0x51   : > { %698 = vmatpush.msrb.mxu2 %v3054_v38  ;;  %2388 = vmatmul.msk.f32.gmra.mxu3 %vm431_vm0, %v3030_v31  ;;  %v3168_v4 = vld [vmem:[#allocation6 + $0x128] sm:$0xff] }
  0x52   : > { %659 = vmatpush.msrb.mxu1 %v3057_v39  ;;  %716 = vmatpush.msrb.mxu3 %v3059_v40  ;;  %v3174_v5 = vld [vmem:[#allocation6 + $0x108] sm:$0xff] }
  0x53   : > { %699 = vmatpush.msrb.mxu2 %v3063_v41  ;;  %824 = vmatpush.msrb.mxu0 %v2956_v9  ;;  %v3180_v8 = vld [vmem:[#allocation6 + $0xe8] sm:$0xff] }
  0x54   : > { %660 = vmatpush.msrb.mxu1 %v3068_v42  ;;  %717 = vmatpush.msrb.mxu3 %v3070_v43  ;;  %v3186_v11 = vld [vmem:[#allocation6 + $0xc8] sm:$0xff] }
  0x55   : > { %700 = vmatpush.msrb.mxu2 %v3074_v44  ;;  %2381 = vmatmul.msk.f32.gmra.mxu1 %vm431_vm0, %v3077_v45  ;;  %v3199_v28 = vld [vmem:[#allocation6 + $0x88] sm:$0xff] }
  0x56   : > { %2385 = vmatmul.msk.f32.gmra.mxu2 %vm431_vm0, %v3077_v45  ;;  %661 = vmatpush.msrb.mxu1 %v3080_v46  ;;  %v3205_v35 = vld [vmem:[#allocation6 + $0x68] sm:$0xff] }
  0x57   : > { %718 = vmatpush.msrb.mxu3 %v3086_v47  ;;  %701 = vmatpush.msrb.mxu2 %v3088_v48 }
  0x58   : > { %662 = vmatpush.msrb.mxu1 %v3093_v49  ;;  %825 = vmatpush.msrb.mxu0 %v2965_v12 }
  0x59   : > { %719 = vmatpush.msrb.mxu3 %v3098_v50  ;;  %702 = vmatpush.msrb.mxu2 %v3100_v51 }
  0x5a   : > { %663 = vmatpush.msrb.mxu1 %v3104_v52  ;;  %2389 = vmatmul.msk.f32.gmra.mxu3 %vm431_vm0, %v3077_v45 }
  0x5b   : > { %720 = vmatpush.msrb.mxu3 %v3107_v53  ;;  %703 = vmatpush.msrb.mxu2 %v3109_v54 }
  0x5c   : > { %664 = vmatpush.msrb.mxu1 %v3114_v55  ;;  %826 = vmatpush.msrb.mxu0 %v2973_v15 }
  0x5d   : > { %721 = vmatpush.msrb.mxu3 %v3119_v56  ;;  %704 = vmatpush.msrb.mxu2 %v3125_v58 }
  0x5e   : > { %669 = vmatpush.msra.mxu1 %v3121_v57  ;;  %705 = vmatmul.f32.vlgmr.msrb.gmra.mxu2 %v3127_v59 }
  0x5f   : > { %665 = vmatmul.f32.vlgmr.msrb.gmra.mxu1 %v3127_v59  ;;  %722 = vmatpush.msrb.mxu3 %v3130_v60 }
  0x60   : > { %670 = vmatpush.msra.mxu1 %v3135_v61  ;;  %863 = vmatpush.msra.mxu2 %v2947_v7 }
  0x61   : > { %723 = vmatpush.msrb.mxu3 %v3139_v62  ;;  %2375 = vmatmul.msk.f32.gmra.mxu0 %vm431_vm0, %v2981_v17  ;;  %v3192_v17 = vld [vmem:[#allocation6 + $0xa8] sm:$0xff] }
  0x62   : > { %671 = vmatpush.msra.mxu1 %v3143_v63  ;;  %864 = vmatpush.msra.mxu2 %v2958_v10 }
  0x63   : > { %724 = vmatpush.msrb.mxu3 %v3146_v0  ;;  %827 = vmatpush.msrb.mxu0 %v2985_v18 }
  0x64   : > { %672 = vmatpush.msra.mxu1 %v3150_v1  ;;  %725 = vmatmul.f32.vlgmr.msrb.gmra.mxu3 %v3127_v59 }
  0x65   : > { %883 = vmatpush.msra.mxu3 %v2971_v14  ;;  %865 = vmatpush.msra.mxu2 %v2969_v13 }
  0x66   : > { %673 = vmatpush.msra.mxu1 %v3156_v2  ;;  %828 = vmatpush.msrb.mxu0 %v2995_v21 }
  0x67   : > { %884 = vmatpush.msra.mxu3 %v2988_v19  ;;  %866 = vmatpush.msra.mxu2 %v2978_v16 }
  0x68   : > { %674 = vmatpush.msra.mxu1 %v3161_v3  ;;  %829 = vmatpush.msrb.mxu0 %v3006_v24 }
  0x69   : > { %885 = vmatpush.msra.mxu3 %v3000_v22  ;;  %867 = vmatpush.msra.mxu2 %v2990_v20 }
  0x6a   : > { %675 = vmatpush.msra.mxu1 %v3168_v4  ;;  %830 = vmatpush.msrb.mxu0 %v3015_v27 }
  0x6b   : > { %886 = vmatpush.msra.mxu3 %v3009_v25  ;;  %868 = vmatpush.msra.mxu2 %v3002_v23 }
  0x6c   : > { %676 = vmatpush.msra.mxu1 %v3174_v5  ;;  %2376 = vmatmul.msk.f32.gmra.mxu0 %vm431_vm0, %v3030_v31  ;;  %v3211_v31 = vld [vmem:[#allocation6 + $0x48] sm:$0xff] }
  0x6d   : > { %887 = vmatpush.msra.mxu3 %v3023_v29  ;;  %869 = vmatpush.msra.mxu2 %v3011_v26 }
  0x6e   : > { %677 = vmatpush.msra.mxu1 %v3180_v8  ;;  %831 = vmatpush.msrb.mxu0 %v3033_v32 }
  0x6f   : > { %888 = vmatpush.msra.mxu3 %v3035_v33  ;;  %870 = vmatpush.msra.mxu2 %v3025_v30 }
  0x70   : > { %678 = vmatpush.msra.mxu1 %v3186_v11  ;;  %832 = vmatpush.msrb.mxu0 %v3048_v36 }
  0x71   : > { %889 = vmatpush.msra.mxu3 %v3050_v37  ;;  %871 = vmatpush.msra.mxu2 %v3039_v34  ;;  %v3217_v34 = vld [vmem:[#allocation6 + $0x28] sm:$0xff] }
  0x72   : > { %679 = vmatpush.msra.mxu1 %v3192_v17  ;;  %833 = vmatpush.msrb.mxu0 %v3057_v39 }
  0x73   : > { %890 = vmatpush.msra.mxu3 %v3059_v40  ;;  %872 = vmatpush.msra.mxu2 %v3054_v38  ;;  %v3223_v38 = vld [vmem:[#allocation6 + $0x8] sm:$0xff] }
  0x74   : > { %680 = vmatpush.msra.mxu1 %v3199_v28  ;;  %834 = vmatpush.msrb.mxu0 %v3068_v42 }
  0x75   : > { %891 = vmatpush.msra.mxu3 %v3070_v43  ;;  %873 = vmatpush.msra.mxu2 %v3063_v41 }
  0x76   : > { %681 = vmatpush.msra.mxu1 %v3205_v35  ;;  %2377 = vmatmul.msk.f32.gmra.mxu0 %vm431_vm0, %v3077_v45 }
  0x77   : > { %892 = vmatpush.msra.mxu3 %v3086_v47  ;;  %874 = vmatpush.msra.mxu2 %v3074_v44 }
  0x78   : > { %682 = vmatpush.msra.mxu1 %v3211_v31  ;;  %835 = vmatpush.msrb.mxu0 %v3080_v46 }
  0x79   : > { %893 = vmatpush.msra.mxu3 %v3098_v50  ;;  %875 = vmatpush.msra.mxu2 %v3088_v48 }
  0x7a   : > { %683 = vmatpush.msra.mxu1 %v3217_v34  ;;  %836 = vmatpush.msrb.mxu0 %v3093_v49 }
  0x7b   : > { %894 = vmatpush.msra.mxu3 %v3107_v53  ;;  %876 = vmatpush.msra.mxu2 %v3100_v51 }
  0x7c   : > { %684 = vmatpush.msra.mxu1 %v3223_v38  ;;  %837 = vmatpush.msrb.mxu0 %v3104_v52 }
  0x7d   : > { %685 = vmatmul.f32.vlgmr.msra.gmra.mxu1 %v3127_v59  ;;  %895 = vmatpush.msra.mxu3 %v3119_v56 }
  0x7e   : > { %843 = vmatpush.msrb.mxu1 %v3121_v57  ;;  %877 = vmatpush.msra.mxu2 %v3109_v54 }
  0x7f   : > { %896 = vmatpush.msra.mxu3 %v3130_v60  ;;  %838 = vmatpush.msrb.mxu0 %v3114_v55 }
  0x80   : > { %844 = vmatpush.msrb.mxu1 %v3135_v61  ;;  %878 = vmatpush.msra.mxu2 %v3125_v58 }
  0x81   : > { %897 = vmatpush.msra.mxu3 %v3139_v62  ;;  %998 = vmatpush.msra.mxu0 %v2945_v6 }
  0x82   : > { %845 = vmatpush.msrb.mxu1 %v3143_v63  ;;  %1038 = vmatpush.msrb.mxu2 %v2947_v7  ;;  %v3947_v7 = vld [vmem:[#allocation22_spill] sm:$0xff] }
  0x83   : > { %898 = vmatpush.msra.mxu3 %v3146_v0  ;;  %999 = vmatpush.msra.mxu0 %v2956_v9  ;;  %v3948_v9 = vld [vmem:[#allocation23_spill] sm:$0xff] }
  0x84   : > { %846 = vmatpush.msrb.mxu1 %v3150_v1  ;;  %1039 = vmatpush.msrb.mxu2 %v2958_v10 }
  0x85   : > { %1058 = vmatpush.msrb.mxu3 %v2971_v14  ;;  %1000 = vmatpush.msra.mxu0 %v2965_v12  ;;  %v421_v12 = vld [vmem:[%s3904_s3] sm:$0xf] }
  0x86   : > { %847 = vmatpush.msrb.mxu1 %v3156_v2  ;;  %1040 = vmatpush.msrb.mxu2 %v2969_v13 }
  0x87   : > { %1059 = vmatpush.msrb.mxu3 %v2988_v19  ;;  %1001 = vmatpush.msra.mxu0 %v2973_v15  ;;  %v424_v15 = vperm.slane %v421_v12, 1 }
  0x88   : > { %848 = vmatpush.msrb.mxu1 %v3161_v3  ;;  %1041 = vmatpush.msrb.mxu2 %v2978_v16 }
  0x89   : > { %1060 = vmatpush.msrb.mxu3 %v3000_v22  ;;  %1002 = vmatpush.msra.mxu0 %v2985_v18 }
  0x8a   : > { %849 = vmatpush.msrb.mxu1 %v3168_v4  ;;  %1042 = vmatpush.msrb.mxu2 %v2990_v20 }
  0x8b   : > { %1061 = vmatpush.msrb.mxu3 %v3009_v25  ;;  %1003 = vmatpush.msra.mxu0 %v2995_v21  ;;  %v425_v21 = vperm.slane %v421_v12, 2 }
  0x8c   : > { %850 = vmatpush.msrb.mxu1 %v3174_v5  ;;  %1043 = vmatpush.msrb.mxu2 %v3002_v23 }
  0x8d   : > { %1062 = vmatpush.msrb.mxu3 %v3023_v29  ;;  %1004 = vmatpush.msra.mxu0 %v3006_v24 }
  0x8e   : > { %851 = vmatpush.msrb.mxu1 %v3180_v8  ;;  %1044 = vmatpush.msrb.mxu2 %v3011_v26 }
  0x8f   : > { %1063 = vmatpush.msrb.mxu3 %v3035_v33  ;;  %1005 = vmatpush.msra.mxu0 %v3015_v27  ;;  %v426_v27 = vperm.slane %v421_v12, 3 }
  0x90   : > { %852 = vmatpush.msrb.mxu1 %v3186_v11  ;;  %1045 = vmatpush.msrb.mxu2 %v3025_v30 }
  0x91   : > { %1064 = vmatpush.msrb.mxu3 %v3050_v37  ;;  %1006 = vmatpush.msra.mxu0 %v3033_v32 }
  0x92   : > { %853 = vmatpush.msrb.mxu1 %v3192_v17  ;;  %1046 = vmatpush.msrb.mxu2 %v3947_v7 }
  0x93   : > { %1065 = vmatpush.msrb.mxu3 %v3059_v40  ;;  %1007 = vmatpush.msra.mxu0 %v3048_v36 }
  0x94   : > { %854 = vmatpush.msrb.mxu1 %v3199_v28  ;;  %1047 = vmatpush.msrb.mxu2 %v3948_v9 }
  0x95   : > { %1066 = vmatpush.msrb.mxu3 %v3070_v43  ;;  %1008 = vmatpush.msra.mxu0 %v3057_v39 }
  0x96   : > { %855 = vmatpush.msrb.mxu1 %v3205_v35  ;;  %1048 = vmatpush.msrb.mxu2 %v3063_v41 }
  0x97   : > { %1067 = vmatpush.msrb.mxu3 %v3086_v47  ;;  %1009 = vmatpush.msra.mxu0 %v3068_v42 }
  0x98   : > { %856 = vmatpush.msrb.mxu1 %v3211_v31  ;;  %1049 = vmatpush.msrb.mxu2 %v3074_v44 }
  0x99   : > { %1068 = vmatpush.msrb.mxu3 %v3098_v50  ;;  %1010 = vmatpush.msra.mxu0 %v3080_v46 }
  0x9a   : > { %857 = vmatpush.msrb.mxu1 %v3217_v34  ;;  %1050 = vmatpush.msrb.mxu2 %v3088_v48 }
  0x9b   : > { %1069 = vmatpush.msrb.mxu3 %v3107_v53  ;;  %1011 = vmatpush.msra.mxu0 %v3093_v49 }
  0x9c   : > { %858 = vmatpush.msrb.mxu1 %v3223_v38  ;;  %1051 = vmatpush.msrb.mxu2 %v3100_v51 }
  0x9d   : > { %1070 = vmatpush.msrb.mxu3 %v3119_v56  ;;  %1012 = vmatpush.msra.mxu0 %v3104_v52 }
  0x9e   : > { %1018 = vmatpush.msra.mxu1 %v3121_v57  ;;  %1052 = vmatpush.msrb.mxu2 %v3109_v54  ;;  %v3345_v54 = vperm.slane %v421_v12, 0 }
  0x9f   : > { %1071 = vmatpush.msrb.mxu3 %v3130_v60  ;;  %1013 = vmatpush.msra.mxu0 %v3114_v55 }
  0xa0   : > { %1019 = vmatpush.msra.mxu1 %v3135_v61  ;;  %1053 = vmatpush.msrb.mxu2 %v3125_v58 }
  0xa1   : > { %1072 = vmatpush.msrb.mxu3 %v3139_v62 }
  0xa2   : > { %1020 = vmatpush.msra.mxu1 %v3143_v63 }
  0xa3   : > { %1073 = vmatpush.msrb.mxu3 %v3146_v0 }
  0xa4   : > { %1021 = vmatpush.msra.mxu1 %v3150_v1 }
  0xa6   : > { %1022 = vmatpush.msra.mxu1 %v3156_v2 }
  0xa8   : > { %1023 = vmatpush.msra.mxu1 %v3161_v3 }
  0xaa   : > { %1024 = vmatpush.msra.mxu1 %v3168_v4 }
  0xac   : > { %1025 = vmatpush.msra.mxu1 %v3174_v5 }
  0xae   : > { %1026 = vmatpush.msra.mxu1 %v3180_v8 }
  0xb0   : > { %1027 = vmatpush.msra.mxu1 %v3186_v11 }
  0xb2   : > { %1028 = vmatpush.msra.mxu1 %v3192_v17 }
  0xb4   : > { %1029 = vmatpush.msra.mxu1 %v3199_v28 }
  0xb6   : > { %1030 = vmatpush.msra.mxu1 %v3205_v35 }
  0xb8   : > { %1031 = vmatpush.msra.mxu1 %v3211_v31 }
  0xb9   : > { %v490_v10 = vpop.f32.mrf.mxu1 }
  0xba   : > { %1032 = vmatpush.msra.mxu1 %v3217_v34  ;;  %v491_v7 = vadd.f32 %v490_v10, %v424_v15 }
  0xbc   : > { %1033 = vmatpush.msra.mxu1 %v3223_v38 }
  0xbf   : > { %v519_v13 = vpop.f32.mrf.mxu2 }
  0xc0   : > { %v520_v9 = vadd.f32 %v519_v13, %v425_v21 }
  0xc1   : > { %v493_v16 = vpop.f32.mrf.mxu1 }
  0xc2   : > { %v3327_v18 = vadd.f32 %v493_v16, %v424_v15 }
  0xc4   : > { %v548_v20 = vpop.f32.mrf.mxu3 }
  0xc5   : > { %v549_v16 = vadd.f32 %v548_v20, %v426_v27 }
  0xc8   : > { %v522_v23 = vpop.f32.mrf.mxu2  ;;  %v461_v55 = vpop.f32.mrf.mxu0 }
  0xc9   : > { %v3329_v24 = vadd.f32 %v522_v23, %v425_v21  ;;  %v462_v58 = vadd.f32 %v461_v55, %v3345_v54 }
  0xca   : > { %v496_v26 = vpop.f32.mrf.mxu1 }
  0xcb   : > { %v3331_v30 = vadd.f32 %v496_v26, %v424_v15 }
  0xcc   : > { %v551_v32 = vpop.f32.mrf.mxu3 }
  0xcd   : > { %v3333_v36 = vadd.f32 %v551_v32, %v426_v27 }
  0xd0   : > { %v525_v39 = vpop.f32.mrf.mxu2 }
  0xd1   : > { %v3335_v41 = vadd.f32 %v525_v39, %v425_v21 }
  0xd2   : > { %v499_v42 = vpop.f32.mrf.mxu1 }
  0xd3   : > { %v3337_v44 = vadd.f32 %v499_v42, %v424_v15 }
  0xd4   : > { %v554_v45 = vpop.f32.mrf.mxu3 }
  0xd5   : > { %v3339_v46 = vadd.f32 %v554_v45, %v426_v27 }
  0xd9   : > { %v528_v48 = vpop.f32.mrf.mxu2 }
  0xda   : > { %v3341_v49 = vadd.f32 %v528_v48, %v425_v21  ;;  %v577_v21 = vld [vmem:[#allocation5 + $0x8] sm:$0xff] }
  0xdc   : > { %v666_v59 = vpop.f32.mrf.mxu1 }
  0xdd   : > { %v557_v51 = vpop.f32.mrf.mxu3  ;;  %v729_v60 = vadd.f32 %v666_v59, %v462_v58 }
  0xde   : > { %v3343_v52 = vadd.f32 %v557_v51, %v426_v27  ;;  %v3348_v0 = vpop.f32.mrf.mxu0 }
  0xdf   : > { %v733_v62 = vmul.f32 0.5, %v729_v60 }
  0xe1   : > { %2484 = vtanh.f32 %v733_v62  ;;  %v706_v23 = vpop.f32.mrf.mxu2 }
  0xe2   : > { %v731_v42 = vadd.f32 %v706_v23, %v520_v9 }
  0xe7   : > { %v726_v32 = vpop.f32.mrf.mxu3  ;;  %v2485_v48 = vpop.eup %2484 }
  0xe8   : > { %v732_v12 = vadd.f32 %v726_v32, %v549_v16  ;;  %v735_v58 = vadd.f32 1.0, %v2485_v48  ;;  %v1129_v48 = vld [vmem:[#allocation6 + $0xa0] sm:$0xff] }
  0xe9   : > { %v467_v51 = vpop.f32.mrf.mxu0 }
  0xea   : > { %v3351_v55 = vadd.f32 %v467_v51, %v3345_v54  ;;  %v742_v59 = vmul.f32 0.5, %v732_v12  ;;  %v736_v13 = vmul.f32 0.5, %v735_v58  ;;  %v1135_v12 = vld [vmem:[#allocation6 + $0xd0] sm:$0xff] }
  0xfa   : > { %v686_v26 = vpop.f32.mrf.mxu1 }
  0xfb   : > { %v730_v39 = vadd.f32 %v686_v26, %v491_v7 }
  0xfd   : > { %v737_v45 = vmul.f32 0.5, %v730_v39 }
  0xff   : > { %2486 = vtanh.f32 %v737_v45 }
 0x100   : > { %2488 = vtanh.f32 %v731_v42  ;;  %v1133_v42 = vld [vmem:[#allocation6 + $0xc0] sm:$0xff] }
 0x101   : > { %2490 = vtanh.f32 %v742_v59 }
 0x105   : > { %v2487_v10 = vpop.eup %2486 }
 0x106   : > { %v739_v15 = vadd.f32 1.0, %v2487_v10  ;;  %v2489_v20 = vpop.eup %2488  ;;  %v1131_v10 = vld [vmem:[#allocation6 + $0xb0] sm:$0xff] }
 0x107   : > { %v747_v60 = vmul.f32 %v2489_v20, %v736_v13  ;;  %v2491_v7 = vpop.eup %2490  ;;  %v1125_v13 = vld [vmem:[#allocation6 + $0x80] sm:$0xff] }
 0x108   : > { %v740_v27 = vmul.f32 0.5, %v739_v15  ;;  %v744_v16 = vadd.f32 1.0, %v2491_v7 }
 0x10a   : > { %v746_v62 = vmul.f32 %v740_v27, %v577_v21  ;;  %v745_v23 = vmul.f32 0.5, %v744_v16  ;;  %v1127_v21 = vld [vmem:[#allocation6 + $0x90] sm:$0xff]  ;;  %v1121_v27 = vld [vmem:[#allocation6 + $0x60] sm:$0xff] }
 0x10c   : > { %v3353_v9 = vadd.f32 %v747_v60, %v746_v62  ;;  %v1123_v60 = vld [vmem:[#allocation6 + $0x70] sm:$0xff] }
 0x10e   : > { %2492 = vtanh.f32 %v3353_v9 }
 0x114   : > { %v2493_v26 = vpop.eup %2492 }
 0x115   : > { %v3356_v32 = vmul.f32 %v2493_v26, %v745_v23  ;;  %v1117_v23 = vld [vmem:[#allocation6 + $0x40] sm:$0xff]  ;;  %v1119_v26 = vld [vmem:[#allocation6 + $0x50] sm:$0xff] }
 0x117   : > { %839 = vmatmul.f32.vlgmr.msrb.gmra.mxu0 %v3356_v32  ;;  %859 = vmatmul.f32.vlgmr.msrb.gmra.mxu1 %v3356_v32 }
 0x118   : > { %879 = vmatmul.f32.vlgmr.msra.gmra.mxu2 %v3356_v32  ;;  %899 = vmatmul.f32.vlgmr.msra.gmra.mxu3 %v3356_v32 }
 0x119   : > { %1173 = vmatpush.msrb.mxu0 %v2945_v6  ;;  %1193 = vmatpush.msrb.mxu1 %v3121_v57  ;;  %v3392_v6 = vpop.f32.mrf.mxu0  ;;  %v1155_v57 = vld [vmem:[#allocation6 + $0x170] sm:$0xff] }
 0x11a   : > { %1233 = vmatpush.msra.mxu3 %v2971_v14  ;;  %v465_v14 = vadd.f32 %v3348_v0, %v3345_v54 }
 0x11b   : > { %1194 = vmatpush.msrb.mxu1 %v3135_v61  ;;  %v1149_v61 = vld [vmem:[#allocation6 + $0x140] sm:$0xff] }
 0x11c   : > { %1234 = vmatpush.msra.mxu3 %v2988_v19  ;;  %v1171_v19 = vld [vmem:[#allocation6 + $0x1f0] sm:$0xff] }
 0x11d   : > { %1195 = vmatpush.msrb.mxu1 %v3143_v63  ;;  %1213 = vmatpush.msra.mxu2 %v1171_v19  ;;  %v1113_v19 = vld [vmem:[#allocation6 + $0x20] sm:$0xff] }
 0x11e   : > { %1235 = vmatpush.msra.mxu3 %v3000_v22  ;;  %v1165_v22 = vld [vmem:[#allocation6 + $0x1c0] sm:$0xff] }
 0x11f   : > { %1196 = vmatpush.msrb.mxu1 %v3150_v1  ;;  %1174 = vmatpush.msrb.mxu0 %v1165_v22  ;;  %v1115_v22 = vld [vmem:[#allocation6 + $0x30] sm:$0xff] }
 0x120   : > { %1236 = vmatpush.msra.mxu3 %v3009_v25  ;;  %v1167_v25 = vld [vmem:[#allocation6 + $0x1d0] sm:$0xff] }
 0x121   : > { %1197 = vmatpush.msrb.mxu1 %v3156_v2  ;;  %1214 = vmatpush.msra.mxu2 %v1167_v25  ;;  %v1151_v2 = vld [vmem:[#allocation6 + $0x150] sm:$0xff]  ;;  %v1116_v25 = vld [vmem:[#allocation6 + $0x38] sm:$0xff] }
 0x122   : > { %1237 = vmatpush.msra.mxu3 %v3023_v29 }
 0x123   : > { %1198 = vmatpush.msrb.mxu1 %v3161_v3  ;;  %v1145_v3 = vld [vmem:[#allocation6 + $0x120] sm:$0xff] }
 0x124   : > { %1238 = vmatpush.msra.mxu3 %v3035_v33 }
 0x125   : > { %1199 = vmatpush.msrb.mxu1 %v3168_v4 }
 0x126   : > { %1239 = vmatpush.msra.mxu3 %v3050_v37  ;;  %v1161_v37 = vld [vmem:[#allocation6 + $0x1a0] sm:$0xff] }
 0x127   : > { %1200 = vmatpush.msrb.mxu1 %v3174_v5  ;;  %1175 = vmatpush.msrb.mxu0 %v1161_v37  ;;  %v1112_v37 = vld [vmem:[#allocation6 + $0x18] sm:$0xff] }
 0x128   : > { %1240 = vmatpush.msra.mxu3 %v3059_v40 }
 0x129   : > { %1201 = vmatpush.msrb.mxu1 %v3180_v8  ;;  %v1147_v8 = vld [vmem:[#allocation6 + $0x130] sm:$0xff] }
 0x12a   : > { %1241 = vmatpush.msra.mxu3 %v3070_v43 }
 0x12b   : > { %1202 = vmatpush.msrb.mxu1 %v3186_v11  ;;  %v1141_v11 = vld [vmem:[#allocation6 + $0x100] sm:$0xff] }
 0x12c   : > { %1242 = vmatpush.msra.mxu3 %v3086_v47  ;;  %v1163_v47 = vld [vmem:[#allocation6 + $0x1b0] sm:$0xff] }
 0x12d   : > { %1203 = vmatpush.msrb.mxu1 %v3192_v17  ;;  %1215 = vmatpush.msra.mxu2 %v1163_v47  ;;  %v1345_v47 = vld [vmem:[#allocation9 + $0x1f0] sm:$0xff] }
 0x12e   : > { %1243 = vmatpush.msra.mxu3 %v3098_v50 }
 0x12f   : > { %1204 = vmatpush.msrb.mxu1 %v3199_v28 }
 0x130   : > { %1244 = vmatpush.msra.mxu3 %v3107_v53  ;;  %v1159_v53 = vld [vmem:[#allocation6 + $0x190] sm:$0xff] }
 0x131   : > { %1205 = vmatpush.msrb.mxu1 %v3205_v35  ;;  %1216 = vmatpush.msra.mxu2 %v1159_v53  ;;  %v1143_v35 = vld [vmem:[#allocation6 + $0x110] sm:$0xff] }
 0x132   : > { %1245 = vmatpush.msra.mxu3 %v3119_v56  ;;  %v1153_v56 = vld [vmem:[#allocation6 + $0x160] sm:$0xff]  ;;  %v1341_v53 = vld [vmem:[#allocation9 + $0x1d0] sm:$0xff] }
 0x133   : > { %1206 = vmatpush.msrb.mxu1 %v3211_v31  ;;  %1217 = vmatpush.msra.mxu2 %v1155_v57  ;;  %v1137_v31 = vld [vmem:[#allocation6 + $0xe0] sm:$0xff] }
 0x134   : > { %v1335_v57 = vld [vmem:[#allocation9 + $0x1a0] sm:$0xff] }
 0x135   : > { %1207 = vmatpush.msrb.mxu1 %v3217_v34  ;;  %v1157_v34 = vld [vmem:[#allocation6 + $0x180] sm:$0xff]  ;;  %1218 = vmatpush.msra.mxu2 %v1151_v2 }
 0x136   : > { %1176 = vmatpush.msrb.mxu0 %v1157_v34  ;;  %v1346_v34 = vld [vmem:[#allocation9 + $0x1f8] sm:$0xff]  ;;  %v1331_v2 = vld [vmem:[#allocation9 + $0x180] sm:$0xff] }
 0x137   : > { %1208 = vmatpush.msrb.mxu1 %v3223_v38  ;;  %1219 = vmatpush.msra.mxu2 %v1147_v8  ;;  %v1327_v8 = vld [vmem:[#allocation9 + $0x160] sm:$0xff] }
 0x138   : > { %1177 = vmatpush.msrb.mxu0 %v1153_v56  ;;  %v1342_v56 = vld [vmem:[#allocation9 + $0x1d8] sm:$0xff] }
 0x139   : > { %1220 = vmatpush.msra.mxu2 %v1143_v35  ;;  %v1323_v35 = vld [vmem:[#allocation9 + $0x140] sm:$0xff] }
 0x13a   : > { %1178 = vmatpush.msrb.mxu0 %v1149_v61  ;;  %v1336_v61 = vld [vmem:[#allocation9 + $0x1a8] sm:$0xff] }
 0x13c   : > { %1179 = vmatpush.msrb.mxu0 %v1145_v3  ;;  %v1332_v3 = vld [vmem:[#allocation9 + $0x188] sm:$0xff] }
 0x13e   : > { %1180 = vmatpush.msrb.mxu0 %v1141_v11  ;;  %v1328_v11 = vld [vmem:[#allocation9 + $0x168] sm:$0xff] }
 0x140   : > { %1181 = vmatpush.msrb.mxu0 %v1137_v31  ;;  %v1324_v31 = vld [vmem:[#allocation9 + $0x148] sm:$0xff] }
 0x142   : > { %1182 = vmatpush.msrb.mxu0 %v1133_v42  ;;  %v1321_v42 = vld [vmem:[#allocation9 + $0x130] sm:$0xff] }
 0x144   : > { %1183 = vmatpush.msrb.mxu0 %v1129_v48  ;;  %v1317_v48 = vld [vmem:[#allocation9 + $0x110] sm:$0xff] }
 0x146   : > { %1184 = vmatpush.msrb.mxu0 %v1125_v13  ;;  %v1314_v13 = vld [vmem:[#allocation9 + $0xf8] sm:$0xff] }
 0x148   : > { %1185 = vmatpush.msrb.mxu0 %v1121_v27  ;;  %v1309_v27 = vld [vmem:[#allocation9 + $0xd0] sm:$0xff] }
 0x14a   : > { %1186 = vmatpush.msrb.mxu0 %v1117_v23  ;;  %v1306_v23 = vld [vmem:[#allocation9 + $0xb8] sm:$0xff] }
 0x14c   : > { %1187 = vmatpush.msrb.mxu0 %v1113_v19  ;;  %v1301_v19 = vld [vmem:[#allocation9 + $0x90] sm:$0xff] }
 0x194   : > { %v840_v29 = vpop.f32.mrf.mxu0  ;;  %v860_v33 = vpop.f32.mrf.mxu1 }
 0x195   : > { %v903_v40 = vadd.f32 %v840_v29, %v465_v14  ;;  %v904_v43 = vadd.f32 %v860_v33, %v3327_v18  ;;  %v1120_v14 = vld [vmem:[#allocation6 + $0x58] sm:$0xff]  ;;  %v1109_v29 = vld [vmem:[#allocation6] sm:$0xff]  ;;  %v1111_v33 = vld [vmem:[#allocation6 + $0x10] sm:$0xff] }
 0x196   : > { %1246 = vmatpush.msra.mxu3 %v1120_v14  ;;  %1188 = vmatpush.msrb.mxu0 %v1109_v29  ;;  %v1300_v14 = vld [vmem:[#allocation9 + $0x88] sm:$0xff] }
 0x197   : > { %v907_v38 = vmul.f32 0.5, %v903_v40  ;;  %v911_v50 = vmul.f32 0.5, %v904_v43  ;;  %v1343_v40 = vld [vmem:[#allocation9 + $0x1e0] sm:$0xff]  ;;  %v1344_v43 = vld [vmem:[#allocation9 + $0x1e8] sm:$0xff] }
 0x198   : > { %1247 = vmatpush.msra.mxu3 %v1116_v25  ;;  %v1295_v25 = vld [vmem:[#allocation9 + $0x60] sm:$0xff]  ;;  %v1296_v29 = vld [vmem:[#allocation9 + $0x68] sm:$0xff] }
 0x199   : > { %2494 = vtanh.f32 %v907_v38  ;;  %v1339_v38 = vld [vmem:[#allocation9 + $0x1c0] sm:$0xff] }
 0x19a   : > { %2496 = vtanh.f32 %v911_v50  ;;  %1248 = vmatpush.msra.mxu3 %v1112_v37  ;;  %v1340_v50 = vld [vmem:[#allocation9 + $0x1c8] sm:$0xff] }
 0x19b   : > { %v880_v63 = vpop.f32.mrf.mxu2  ;;  %v900_v1 = vpop.f32.mrf.mxu3 }
 0x19c   : > { %v905_v4 = vadd.f32 %v880_v63, %v3329_v24  ;;  %v906_v5 = vadd.f32 %v900_v1, %v3333_v36  ;;  %v1139_v24 = vld [vmem:[#allocation6 + $0xf0] sm:$0xff]  ;;  %v1338_v1 = vld [vmem:[#allocation9 + $0x1b8] sm:$0xff] }
 0x19d   : > { %1221 = vmatpush.msra.mxu2 %v1139_v24  ;;  %v1337_v63 = vld [vmem:[#allocation9 + $0x1b0] sm:$0xff]  ;;  %v1320_v24 = vld [vmem:[#allocation9 + $0x128] sm:$0xff] }
 0x19e   : > { %2498 = vtanh.f32 %v905_v4  ;;  %v916_v17 = vmul.f32 0.5, %v906_v5  ;;  %v1333_v4 = vld [vmem:[#allocation9 + $0x190] sm:$0xff]  ;;  %v1334_v5 = vld [vmem:[#allocation9 + $0x198] sm:$0xff] }
 0x19f   : > { %v2495_v28 = vpop.eup %2494  ;;  %1222 = vmatpush.msra.mxu2 %v1135_v12  ;;  %v1316_v12 = vld [vmem:[#allocation9 + $0x108] sm:$0xff] }
 0x1a0   : > { %v2497_v18 = vpop.eup %2496  ;;  %v909_v0 = vadd.f32 1.0, %v2495_v28  ;;  %2500 = vtanh.f32 %v916_v17  ;;  %v1329_v17 = vld [vmem:[#allocation9 + $0x170] sm:$0xff]  ;;  %v1330_v28 = vld [vmem:[#allocation9 + $0x178] sm:$0xff] }
 0x1a1   : > { %v913_v39 = vadd.f32 1.0, %v2497_v18  ;;  %1223 = vmatpush.msra.mxu2 %v1131_v10  ;;  %v1325_v18 = vld [vmem:[#allocation9 + $0x150] sm:$0xff] }
 0x1a2   : > { %v910_v36 = vmul.f32 0.5, %v909_v0  ;;  %v1326_v0 = vld [vmem:[#allocation9 + $0x158] sm:$0xff]  ;;  %v1313_v10 = vld [vmem:[#allocation9 + $0xf0] sm:$0xff] }
 0x1a3   : > { %v914_v45 = vmul.f32 0.5, %v913_v39  ;;  %1224 = vmatpush.msra.mxu2 %v1127_v21  ;;  %v1319_v39 = vld [vmem:[#allocation9 + $0x120] sm:$0xff]  ;;  %v1308_v21 = vld [vmem:[#allocation9 + $0xc8] sm:$0xff] }
 0x1a4   : > { %v2499_v51 = vpop.eup %2498 }
 0x1a5   : > { %v920_v58 = vmul.f32 %v914_v45, %v3353_v9  ;;  %v921_v59 = vmul.f32 %v2499_v51, %v910_v36  ;;  %1225 = vmatpush.msra.mxu2 %v1123_v60  ;;  %v1322_v36 = vld [vmem:[#allocation9 + $0x138] sm:$0xff]  ;;  %v1315_v45 = vld [vmem:[#allocation9 + $0x100] sm:$0xff] }
 0x1a6   : > { %v2501_v15 = vpop.eup %2500  ;;  %v1318_v51 = vld [vmem:[#allocation9 + $0x118] sm:$0xff] }
 0x1a7   : > { %v3400_v20 = vadd.f32 %v921_v59, %v920_v58  ;;  %v918_v62 = vadd.f32 1.0, %v2501_v15  ;;  %1226 = vmatpush.msra.mxu2 %v1119_v26  ;;  %v1311_v58 = vld [vmem:[#allocation9 + $0xe0] sm:$0xff]  ;;  %v1312_v59 = vld [vmem:[#allocation9 + $0xe8] sm:$0xff]  ;;  %v1310_v60 = vld [vmem:[#allocation9 + $0xd8] sm:$0xff] }
 0x1a8   : > { %v1307_v15 = vld [vmem:[#allocation9 + $0xc0] sm:$0xff] }
 0x1a9   : > { %2502 = vtanh.f32 %v3400_v20  ;;  %v919_v7 = vmul.f32 0.5, %v918_v62  ;;  %1227 = vmatpush.msra.mxu2 %v1115_v22  ;;  %v1303_v62 = vld [vmem:[#allocation9 + $0xa0] sm:$0xff]  ;;  %v1302_v22 = vld [vmem:[#allocation9 + $0x98] sm:$0xff] }
 0x1aa   : > { %v1299_v26 = vld [vmem:[#allocation9 + $0x80] sm:$0xff] }
 0x1ab   : > { %1228 = vmatpush.msra.mxu2 %v1111_v33  ;;  %v1297_v33 = vld [vmem:[#allocation9 + $0x70] sm:$0xff] }
 0x1af   : > { %v2503_v9 = vpop.eup %2502 }
 0x1b0   : > { %v3403_v16 = vmul.f32 %v2503_v9, %v919_v7  ;;  %v1304_v7 = vld [vmem:[#allocation9 + $0xa8] sm:$0xff]  ;;  %v1305_v9 = vld [vmem:[#allocation9 + $0xb0] sm:$0xff] }
 0x1b2   : > { %1014 = vmatmul.f32.vlgmr.msra.gmra.mxu0 %v3403_v16  ;;  %1034 = vmatmul.f32.vlgmr.msra.gmra.mxu1 %v3403_v16 }
 0x1b3   : > { %1054 = vmatmul.f32.vlgmr.msrb.gmra.mxu2 %v3403_v16  ;;  %1074 = vmatmul.f32.vlgmr.msrb.gmra.mxu3 %v3403_v16 }
 0x1b4   : > { %1357 = vmatpush.msra.mxu0 %v1343_v40  ;;  %1386 = vmatpush.msra.mxu1 %v1344_v43  ;;  %v1298_v43 = vld [vmem:[#allocation9 + $0x78] sm:$0xff] }
 0x1b5   : > { %1415 = vmatpush.msrb.mxu2 %v1345_v47  ;;  %1444 = vmatpush.msrb.mxu3 %v1346_v34  ;;  %v1291_v47 = vld [vmem:[#allocation9 + $0x40] sm:$0xff]  ;;  %v1292_v34 = vld [vmem:[#allocation9 + $0x48] sm:$0xff] }
 0x1b6   : > { %1358 = vmatpush.msra.mxu0 %v1339_v38  ;;  %1387 = vmatpush.msra.mxu1 %v1340_v50 }
 0x1b7   : > { %1416 = vmatpush.msrb.mxu2 %v1341_v53  ;;  %1445 = vmatpush.msrb.mxu3 %v1342_v56  ;;  %v1293_v53 = vld [vmem:[#allocation9 + $0x50] sm:$0xff]  ;;  %v1294_v56 = vld [vmem:[#allocation9 + $0x58] sm:$0xff] }
 0x1b8   : > { %1359 = vmatpush.msra.mxu0 %v1335_v57  ;;  %1388 = vmatpush.msra.mxu1 %v1336_v61  ;;  %v1287_v57 = vld [vmem:[#allocation9 + $0x20] sm:$0xff]  ;;  %v1288_v61 = vld [vmem:[#allocation9 + $0x28] sm:$0xff] }
 0x1b9   : > { %1417 = vmatpush.msrb.mxu2 %v1337_v63  ;;  %1446 = vmatpush.msrb.mxu3 %v1338_v1  ;;  %v1289_v63 = vld [vmem:[#allocation9 + $0x30] sm:$0xff]  ;;  %v1290_v1 = vld [vmem:[#allocation9 + $0x38] sm:$0xff] }
 0x1ba   : > { %1360 = vmatpush.msra.mxu0 %v1331_v2  ;;  %1389 = vmatpush.msra.mxu1 %v1332_v3 }
 0x1bb   : > { %1418 = vmatpush.msrb.mxu2 %v1333_v4  ;;  %1447 = vmatpush.msrb.mxu3 %v1334_v5  ;;  %v1283_v4 = vld [vmem:[#allocation9] sm:$0xff]  ;;  %v1284_v5 = vld [vmem:[#allocation9 + $0x8] sm:$0xff] }
 0x1bc   : > { %1361 = vmatpush.msra.mxu0 %v1327_v8  ;;  %1390 = vmatpush.msra.mxu1 %v1328_v11 }
 0x1bd   : > { %1419 = vmatpush.msrb.mxu2 %v1329_v17  ;;  %1448 = vmatpush.msrb.mxu3 %v1330_v28 }
 0x1be   : > { %1362 = vmatpush.msra.mxu0 %v1323_v35  ;;  %1391 = vmatpush.msra.mxu1 %v1324_v31 }
 0x1bf   : > { %1420 = vmatpush.msrb.mxu2 %v1325_v18  ;;  %1449 = vmatpush.msrb.mxu3 %v1326_v0 }
 0x1c0   : > { %1363 = vmatpush.msra.mxu0 %v1319_v39  ;;  %1392 = vmatpush.msra.mxu1 %v1320_v24 }
 0x1c1   : > { %1421 = vmatpush.msrb.mxu2 %v1321_v42  ;;  %1450 = vmatpush.msrb.mxu3 %v1322_v36 }
 0x1c2   : > { %1364 = vmatpush.msra.mxu0 %v1315_v45  ;;  %1393 = vmatpush.msra.mxu1 %v1316_v12 }
 0x1c3   : > { %1422 = vmatpush.msrb.mxu2 %v1317_v48  ;;  %1451 = vmatpush.msrb.mxu3 %v1318_v51 }
 0x1c4   : > { %1365 = vmatpush.msra.mxu0 %v1311_v58  ;;  %1394 = vmatpush.msra.mxu1 %v1312_v59 }
 0x1c5   : > { %1423 = vmatpush.msrb.mxu2 %v1313_v10  ;;  %1452 = vmatpush.msrb.mxu3 %v1314_v13  ;;  %v3427_v10 = vld [vmem:[#allocation11 + $0x1e8] sm:$0xff]  ;;  %v3429_v13 = vld [vmem:[#allocation11 + $0x1f0] sm:$0xff] }
 0x1c6   : > { %1366 = vmatpush.msra.mxu0 %v1307_v15  ;;  %1395 = vmatpush.msra.mxu1 %v1308_v21  ;;  %v3439_v15 = vld [vmem:[#allocation11 + $0x1c8] sm:$0xff]  ;;  %v3441_v21 = vld [vmem:[#allocation11 + $0x1d0] sm:$0xff] }
 0x1c7   : > { %1424 = vmatpush.msrb.mxu2 %v1309_v27  ;;  %1453 = vmatpush.msrb.mxu3 %v1310_v60  ;;  %v3445_v27 = vld [vmem:[#allocation11 + $0x1d8] sm:$0xff]  ;;  %v3449_v60 = vld [vmem:[#allocation11 + $0x1a0] sm:$0xff] }
 0x1c8   : > { %1367 = vmatpush.msra.mxu0 %v1303_v62  ;;  %1396 = vmatpush.msra.mxu1 %v1304_v7  ;;  %v3451_v62 = vld [vmem:[#allocation11 + $0x1a8] sm:$0xff]  ;;  %v3453_v7 = vld [vmem:[#allocation11 + $0x1b0] sm:$0xff] }
 0x1c9   : > { %1425 = vmatpush.msrb.mxu2 %v1305_v9  ;;  %1454 = vmatpush.msrb.mxu3 %v1306_v23  ;;  %v3457_v9 = vld [vmem:[#allocation11 + $0x1b8] sm:$0xff]  ;;  %v3461_v23 = vld [vmem:[#allocation11 + $0x180] sm:$0xff] }
 0x1ca   : > { %1368 = vmatpush.msra.mxu0 %v1299_v26  ;;  %1397 = vmatpush.msra.mxu1 %v1300_v14  ;;  %v3463_v26 = vld [vmem:[#allocation11 + $0x188] sm:$0xff]  ;;  %v3465_v14 = vld [vmem:[#allocation11 + $0x190] sm:$0xff] }
 0x1cb   : > { %1426 = vmatpush.msrb.mxu2 %v1301_v19  ;;  %1455 = vmatpush.msrb.mxu3 %v1302_v22  ;;  %v3469_v19 = vld [vmem:[#allocation11 + $0x198] sm:$0xff]  ;;  %v3473_v22 = vld [vmem:[#allocation11 + $0x160] sm:$0xff] }
 0x1cc   : > { %1369 = vmatpush.msra.mxu0 %v1295_v25  ;;  %1398 = vmatpush.msra.mxu1 %v1296_v29  ;;  %v3475_v25 = vld [vmem:[#allocation11 + $0x168] sm:$0xff]  ;;  %v3477_v29 = vld [vmem:[#allocation11 + $0x170] sm:$0xff] }
 0x1cd   : > { %1427 = vmatpush.msrb.mxu2 %v1297_v33  ;;  %1456 = vmatpush.msrb.mxu3 %v1298_v43  ;;  %v3481_v33 = vld [vmem:[#allocation11 + $0x178] sm:$0xff]  ;;  %v3489_v43 = vld [vmem:[#allocation11 + $0x150] sm:$0xff] }
 0x1ce   : > { %1370 = vmatpush.msra.mxu0 %v1291_v47  ;;  %1399 = vmatpush.msra.mxu1 %v1292_v34  ;;  %v3493_v47 = vld [vmem:[#allocation11 + $0x158] sm:$0xff]  ;;  %v3497_v34 = vld [vmem:[#allocation11 + $0x120] sm:$0xff] }
 0x1cf   : > { %1428 = vmatpush.msrb.mxu2 %v1293_v53  ;;  %1457 = vmatpush.msrb.mxu3 %v1294_v56  ;;  %v3505_v53 = vld [vmem:[#allocation11 + $0x138] sm:$0xff]  ;;  %v3509_v56 = vld [vmem:[#allocation11 + $0x100] sm:$0xff] }
 0x1d0   : > { %1371 = vmatpush.msra.mxu0 %v1287_v57  ;;  %1400 = vmatpush.msra.mxu1 %v1288_v61  ;;  %v3511_v57 = vld [vmem:[#allocation11 + $0x108] sm:$0xff]  ;;  %v3513_v61 = vld [vmem:[#allocation11 + $0x110] sm:$0xff] }
 0x1d1   : > { %1429 = vmatpush.msrb.mxu2 %v1289_v63  ;;  %1458 = vmatpush.msrb.mxu3 %v1290_v1  ;;  %v3517_v63 = vld [vmem:[#allocation11 + $0x118] sm:$0xff]  ;;  %v3521_v1 = vld [vmem:[#allocation11 + $0xe0] sm:$0xff] }
 0x1d2   : > { %1372 = vmatpush.msra.mxu0 %v1283_v4  ;;  %1401 = vmatpush.msra.mxu1 %v1284_v5  ;;  %v3529_v4 = vld [vmem:[#allocation11 + $0xf8] sm:$0xff]  ;;  %v3533_v5 = vld [vmem:[#allocation11 + $0xc0] sm:$0xff] }
 0x22f   : > { %v1015_v37 = vpop.f32.mrf.mxu0  ;;  %v1035_v40 = vpop.f32.mrf.mxu1 }
 0x230   : > { %v1078_v38 = vadd.f32 %v1015_v37, %v3351_v55  ;;  %v1079_v50 = vadd.f32 %v1035_v40, %v3331_v30  ;;  %v1285_v55 = vld [vmem:[#allocation9 + $0x10] sm:$0xff]  ;;  %v1286_v30 = vld [vmem:[#allocation9 + $0x18] sm:$0xff]  ;;  %v3485_v37 = vld [vmem:[#allocation11 + $0x140] sm:$0xff] }
 0x231   : > { %1430 = vmatpush.msrb.mxu2 %v1285_v55  ;;  %1459 = vmatpush.msrb.mxu3 %v1286_v30  ;;  %v3487_v40 = vld [vmem:[#allocation11 + $0x148] sm:$0xff]  ;;  %v3537_v30 = vld [vmem:[#allocation11 + $0xd0] sm:$0xff] }
 0x232   : > { %v1082_v2 = vmul.f32 0.5, %v1078_v38  ;;  %v1086_v3 = vmul.f32 0.5, %v1079_v50  ;;  %v3499_v38 = vld [vmem:[#allocation11 + $0x128] sm:$0xff]  ;;  %v3501_v50 = vld [vmem:[#allocation11 + $0x130] sm:$0xff] }
 0x233   : > { %v3535_v55 = vld [vmem:[#allocation11 + $0xc8] sm:$0xff] }
 0x234   : > { %2504 = vtanh.f32 %v1082_v2  ;;  %v3523_v2 = vld [vmem:[#allocation11 + $0xe8] sm:$0xff] }
 0x235   : > { %2506 = vtanh.f32 %v1086_v3  ;;  %v3525_v3 = vld [vmem:[#allocation11 + $0xf0] sm:$0xff] }
 0x236   : > { %v1055_v8 = vpop.f32.mrf.mxu2  ;;  %v1075_v11 = vpop.f32.mrf.mxu3 }
 0x237   : > { %v1080_v17 = vadd.f32 %v1055_v8, %v3335_v41  ;;  %v1081_v28 = vadd.f32 %v1075_v11, %v3339_v46  ;;  %v3541_v8 = vld [vmem:[#allocation11 + $0xd8] sm:$0xff]  ;;  %v3545_v11 = vld [vmem:[#allocation11 + $0xa0] sm:$0xff] }
 0x239   : > { %2508 = vtanh.f32 %v1080_v17  ;;  %v1091_v35 = vmul.f32 0.5, %v1081_v28  ;;  %v3547_v17 = vld [vmem:[#allocation11 + $0xa8] sm:$0xff]  ;;  %v3549_v28 = vld [vmem:[#allocation11 + $0xb0] sm:$0xff] }
 0x23a   : > { %v2505_v31 = vpop.eup %2504 }
 0x23b   : > { %v2507_v18 = vpop.eup %2506  ;;  %v1084_v0 = vadd.f32 1.0, %v2505_v31  ;;  %2510 = vtanh.f32 %v1091_v35  ;;  %v3553_v35 = vld [vmem:[#allocation11 + $0xb8] sm:$0xff]  ;;  %v3557_v31 = vld [vmem:[#allocation11 + $0x80] sm:$0xff] }
 0x23c   : > { %v1088_v39 = vadd.f32 1.0, %v2507_v18  ;;  %v3559_v18 = vld [vmem:[#allocation11 + $0x88] sm:$0xff] }
 0x23d   : > { %v1085_v24 = vmul.f32 0.5, %v1084_v0  ;;  %v3561_v0 = vld [vmem:[#allocation11 + $0x90] sm:$0xff] }
 0x23e   : > { %v1089_v42 = vmul.f32 0.5, %v1088_v39  ;;  %3949 = vst [vmem:[#allocation22_spill] sm:$0xff] %v3561_v0  ;;  %v3565_v39 = vld [vmem:[#allocation11 + $0x98] sm:$0xff] }
 0x23f   : > { %v2509_v36 = vpop.eup %2508  ;;  %3950 = vst [vmem:[#allocation23_spill] sm:$0xff] %v3565_v39 }
 0x240   : > { %v1095_v45 = vmul.f32 %v1089_v42, %v3400_v20  ;;  %v1096_v12 = vmul.f32 %v2509_v36, %v1085_v24  ;;  %v3425_v20 = vld [vmem:[#allocation11 + $0x1e0] sm:$0xff]  ;;  %v471_v24 = vadd.f32 %v3392_v6, %v3345_v54  ;;  %v3573_v36 = vld [vmem:[#allocation11 + $0x68] sm:$0xff]  ;;  %v3588_v6 = vld [vmem:[#allocation11 + $0x50] sm:$0xff] }
 0x241   : > { %v2511_v48 = vpop.eup %2510  ;;  %v3571_v42 = vld [vmem:[#allocation11 + $0x60] sm:$0xff]  ;;  %3952 = vst [vmem:[#allocation25_spill] sm:$0xff] %v3573_v36 }
 0x242   : > { %v3414_v51 = vadd.f32 %v1096_v12, %v1095_v45  ;;  %v1093_v41 = vadd.f32 1.0, %v2511_v48  ;;  %3951 = vst [vmem:[#allocation24_spill] sm:$0xff] %v3571_v42  ;;  %v3575_v45 = vld [vmem:[#allocation11 + $0x70] sm:$0xff] }
 0x244   : > { %2512 = vtanh.f32 %v3414_v51  ;;  %v1094_v46 = vmul.f32 0.5, %v1093_v41  ;;  %v3579_v41 = vld [vmem:[#allocation11 + $0x78] sm:$0xff] }
 0x245   : > { %3953 = vst [vmem:[#allocation26_spill] sm:$0xff] %v3579_v41 }
 0x24a   : > { %v2513_v58 = vpop.eup %2512 }
 0x24b   : > { %v1099_v59 = vmul.f32 %v2513_v58, %v1094_v46  ;;  %v3581_v46 = vld [vmem:[#allocation11 + $0x40] sm:$0xff]  ;;  %v3583_v58 = vld [vmem:[#allocation11 + $0x48] sm:$0xff] }
 0x24c   : > { %3954 = vst [vmem:[#allocation27_spill] sm:$0xff] %v3581_v46 }
 0x24d   : > { %1189 = vmatmul.f32.vlgmr.msrb.gmra.mxu0 %v1099_v59  ;;  %1209 = vmatmul.f32.vlgmr.msrb.gmra.mxu1 %v1099_v59  ;;  %3955 = vst [vmem:[#allocation28_spill] sm:$0xff] %v3583_v58 }
 0x24e   : > { %1229 = vmatmul.f32.vlgmr.msra.gmra.mxu2 %v1099_v59  ;;  %1249 = vmatmul.f32.vlgmr.msra.gmra.mxu3 %v1099_v59 }
 0x24f   : > { %1561 = vmatpush.msrb.mxu0 %v3425_v20  ;;  %1581 = vmatpush.msrb.mxu1 %v3427_v10 }
 0x250   : > { %1601 = vmatpush.msra.mxu2 %v3429_v13 }
 0x251   : > { %1582 = vmatpush.msrb.mxu1 %v3439_v15 }
 0x252   : > { %1602 = vmatpush.msra.mxu2 %v3441_v21 }
 0x253   : > { %1583 = vmatpush.msrb.mxu1 %v3451_v62 }
 0x254   : > { %1603 = vmatpush.msra.mxu2 %v3453_v7 }
 0x255   : > { %1373 = vmatmul.f32.vlgmr.msra.gmra.mxu0 %v3356_v32  ;;  %1402 = vmatmul.f32.vlgmr.msra.gmra.mxu1 %v3356_v32 }
 0x256   : > { %1431 = vmatmul.f32.vlgmr.msrb.gmra.mxu2 %v3356_v32  ;;  %1460 = vmatmul.f32.vlgmr.msrb.gmra.mxu3 %v3356_v32  ;;  %v3433_v32 = vld [vmem:[#allocation11 + $0x1f8] sm:$0xff] }
 0x257   : > { %1621 = vmatpush.msra.mxu3 %v3433_v32  ;;  %1584 = vmatpush.msrb.mxu1 %v3463_v26 }
 0x258   : > { %1604 = vmatpush.msra.mxu2 %v3465_v14 }
 0x259   : > { %1622 = vmatpush.msra.mxu3 %v3445_v27  ;;  %1585 = vmatpush.msrb.mxu1 %v3475_v25 }
 0x25a   : > { %1605 = vmatpush.msra.mxu2 %v3477_v29 }
 0x25b   : > { %1623 = vmatpush.msra.mxu3 %v3457_v9  ;;  %1586 = vmatpush.msrb.mxu1 %v3487_v40 }
 0x25c   : > { %1606 = vmatpush.msra.mxu2 %v3489_v43 }
 0x25d   : > { %1376 = vmatmul.f32.gmra.mxu0 %v3403_v16  ;;  %1405 = vmatmul.f32.gmra.mxu1 %v3403_v16 }
 0x25e   : > { %1434 = vmatmul.f32.gmra.mxu2 %v3403_v16  ;;  %1463 = vmatmul.f32.gmra.mxu3 %v3403_v16  ;;  %v3437_v16 = vld [vmem:[#allocation11 + $0x1c0] sm:$0xff] }
 0x25f   : > { %1562 = vmatpush.msrb.mxu0 %v3437_v16  ;;  %1624 = vmatpush.msra.mxu3 %v3469_v19 }
 0x260   : > { %1587 = vmatpush.msrb.mxu1 %v3499_v38  ;;  %1607 = vmatpush.msra.mxu2 %v3501_v50 }
 0x261   : > { %1563 = vmatpush.msrb.mxu0 %v3449_v60  ;;  %1625 = vmatpush.msra.mxu3 %v3481_v33 }
 0x262   : > { %1588 = vmatpush.msrb.mxu1 %v3511_v57  ;;  %1608 = vmatpush.msra.mxu2 %v3513_v61 }
 0x263   : > { %1564 = vmatpush.msrb.mxu0 %v3461_v23  ;;  %1626 = vmatpush.msra.mxu3 %v3493_v47 }
 0x264   : > { %1589 = vmatpush.msrb.mxu1 %v3523_v2  ;;  %1609 = vmatpush.msra.mxu2 %v3525_v3 }
 0x265   : > { %1379 = vmatmul.f32.gmra.mxu0 %v1099_v59  ;;  %1408 = vmatmul.f32.gmra.mxu1 %v1099_v59 }
 0x266   : > { %1437 = vmatmul.f32.gmra.mxu2 %v1099_v59  ;;  %1466 = vmatmul.f32.gmra.mxu3 %v1099_v59 }
 0x267   : > { %1565 = vmatpush.msrb.mxu0 %v3473_v22  ;;  %1627 = vmatpush.msra.mxu3 %v3505_v53 }
 0x268   : > { %1590 = vmatpush.msrb.mxu1 %v3535_v55  ;;  %1610 = vmatpush.msra.mxu2 %v3537_v30 }
 0x269   : > { %1566 = vmatpush.msrb.mxu0 %v3485_v37  ;;  %1628 = vmatpush.msra.mxu3 %v3517_v63 }
 0x26a   : > { %1591 = vmatpush.msrb.mxu1 %v3547_v17  ;;  %1611 = vmatpush.msra.mxu2 %v3549_v28 }
 0x26b   : > { %1567 = vmatpush.msrb.mxu0 %v3497_v34  ;;  %1629 = vmatpush.msra.mxu3 %v3529_v4 }
 0x26c   : > { %1592 = vmatpush.msrb.mxu1 %v3559_v18  ;;  %1612 = vmatpush.msra.mxu2 %v3561_v0  ;;  %v3598_v0 = vld [vmem:[#allocation11 + $0x30] sm:$0xff] }
 0x26d   : > { %1568 = vmatpush.msrb.mxu0 %v3509_v56  ;;  %1630 = vmatpush.msra.mxu3 %v3541_v8 }
 0x26e   : > { %1593 = vmatpush.msrb.mxu1 %v3573_v36  ;;  %1613 = vmatpush.msra.mxu2 %v3575_v45  ;;  %v3596_v36 = vld [vmem:[#allocation11 + $0x28] sm:$0xff] }
 0x26f   : > { %1569 = vmatpush.msrb.mxu0 %v3521_v1  ;;  %1631 = vmatpush.msra.mxu3 %v3553_v35  ;;  %3957 = vst [vmem:[#allocation30_spill] sm:$0xff] %v3596_v36 }
 0x270   : > { %1594 = vmatpush.msrb.mxu1 %v3583_v58  ;;  %1614 = vmatpush.msra.mxu2 %v3588_v6  ;;  %v3610_v58 = vld [vmem:[#allocation11 + $0x10] sm:$0xff] }
 0x271   : > { %1570 = vmatpush.msrb.mxu0 %v3533_v5  ;;  %1632 = vmatpush.msra.mxu3 %v3565_v39  ;;  %v3590_v39 = vld [vmem:[#allocation11 + $0x58] sm:$0xff] }
 0x272   : > { %1595 = vmatpush.msrb.mxu1 %v3596_v36  ;;  %1615 = vmatpush.msra.mxu2 %v3598_v0 }
 0x273   : > { %1571 = vmatpush.msrb.mxu0 %v3545_v11  ;;  %1633 = vmatpush.msra.mxu3 %v3579_v41  ;;  %v3606_v41 = vld [vmem:[#allocation11 + $0x8] sm:$0xff] }
 0x274   : > { %1596 = vmatpush.msrb.mxu1 %v3606_v41  ;;  %1616 = vmatpush.msra.mxu2 %v3610_v58 }
 0x275   : > { %1572 = vmatpush.msrb.mxu0 %v3557_v31  ;;  %1634 = vmatpush.msra.mxu3 %v3590_v39 }
 0x276   : > { %1752 = vmatpush.msra.mxu1 %v3427_v10  ;;  %1772 = vmatpush.msrb.mxu2 %v3429_v13 }
 0x277   : > { %1573 = vmatpush.msrb.mxu0 %v3571_v42  ;;  %v3592_v42 = vld [vmem:[#allocation11 + $0x20] sm:$0xff] }
 0x278   : > { %3956 = vst [vmem:[#allocation29_spill] sm:$0xff] %v3592_v42  ;;  %1753 = vmatpush.msra.mxu1 %v3439_v15  ;;  %1773 = vmatpush.msrb.mxu2 %v3441_v21 }
 0x279   : > { %1574 = vmatpush.msrb.mxu0 %v3581_v46  ;;  %v3612_v46 = vld [vmem:[#allocation11 + $0x18] sm:$0xff] }
 0x27a   : > { %1754 = vmatpush.msra.mxu1 %v3451_v62  ;;  %1774 = vmatpush.msrb.mxu2 %v3453_v7 }
 0x27b   : > { %1575 = vmatpush.msrb.mxu0 %v3592_v42 }
 0x27c   : > { %1755 = vmatpush.msra.mxu1 %v3463_v26  ;;  %1775 = vmatpush.msrb.mxu2 %v3465_v14 }
 0x27e   : > { %1756 = vmatpush.msra.mxu1 %v3475_v25  ;;  %1776 = vmatpush.msrb.mxu2 %v3477_v29 }
 0x280   : > { %1757 = vmatpush.msra.mxu1 %v3487_v40  ;;  %1777 = vmatpush.msrb.mxu2 %v3489_v43 }
 0x282   : > { %1758 = vmatpush.msra.mxu1 %v3499_v38  ;;  %1778 = vmatpush.msrb.mxu2 %v3501_v50 }
 0x284   : > { %1759 = vmatpush.msra.mxu1 %v3511_v57  ;;  %1779 = vmatpush.msrb.mxu2 %v3513_v61 }
 0x286   : > { %1760 = vmatpush.msra.mxu1 %v3523_v2  ;;  %1780 = vmatpush.msrb.mxu2 %v3525_v3 }
 0x288   : > { %1761 = vmatpush.msra.mxu1 %v3535_v55  ;;  %1781 = vmatpush.msrb.mxu2 %v3537_v30 }
 0x28a   : > { %1762 = vmatpush.msra.mxu1 %v3547_v17  ;;  %1782 = vmatpush.msrb.mxu2 %v3549_v28 }
 0x28c   : > { %1763 = vmatpush.msra.mxu1 %v3559_v18 }
 0x2ca   : > { %v1190_v12 = vpop.f32.mrf.mxu0  ;;  %v1210_v48 = vpop.f32.mrf.mxu1 }
 0x2cb   : > { %v1253_v59 = vadd.f32 %v1190_v12, %v471_v24  ;;  %v1254_v54 = vadd.f32 %v1210_v48, %v3337_v44  ;;  %v3600_v24 = vld [vmem:[#allocation11 + $0x38] sm:$0xff]  ;;  %v3604_v48 = vld [vmem:[#allocation11] sm:$0xff] }
 0x2cc   : > { %1635 = vmatpush.msra.mxu3 %v3600_v24  ;;  %1576 = vmatpush.msrb.mxu0 %v3604_v48 }
 0x2cd   : > { %v1257_v44 = vmul.f32 0.5, %v1253_v59  ;;  %v1261_v12 = vmul.f32 0.5, %v1254_v54 }
 0x2ce   : > { %1636 = vmatpush.msra.mxu3 %v3612_v46  ;;  %1732 = vmatpush.msra.mxu0 %v3425_v20 }
 0x2cf   : > { %2514 = vtanh.f32 %v1257_v44 }
 0x2d0   : > { %2516 = vtanh.f32 %v1261_v12  ;;  %1792 = vmatpush.msrb.mxu3 %v3433_v32  ;;  %1733 = vmatpush.msra.mxu0 %v3437_v16 }
 0x2d1   : > { %v1230_v59 = vpop.f32.mrf.mxu2  ;;  %v1250_v54 = vpop.f32.mrf.mxu3 }
 0x2d2   : > { %v1255_v36 = vadd.f32 %v1230_v59, %v3341_v49  ;;  %v1256_v42 = vadd.f32 %v1250_v54, %v3343_v52  ;;  %1793 = vmatpush.msrb.mxu3 %v3445_v27  ;;  %1734 = vmatpush.msra.mxu0 %v3449_v60 }
 0x2d4   : > { %2518 = vtanh.f32 %v1255_v36  ;;  %v1266_v44 = vmul.f32 0.5, %v1256_v42  ;;  %1794 = vmatpush.msrb.mxu3 %v3457_v9  ;;  %1735 = vmatpush.msra.mxu0 %v3461_v23 }
 0x2d5   : > { %v2515_v12 = vpop.eup %2514 }
 0x2d6   : > { %v2517_v49 = vpop.eup %2516  ;;  %v1259_v52 = vadd.f32 1.0, %v2515_v12  ;;  %2520 = vtanh.f32 %v1266_v44  ;;  %1795 = vmatpush.msrb.mxu3 %v3469_v19  ;;  %1736 = vmatpush.msra.mxu0 %v3473_v22 }
 0x2d7   : > { %v1263_v59 = vadd.f32 1.0, %v2517_v49 }
 0x2d8   : > { %v1260_v42 = vmul.f32 0.5, %v1259_v52  ;;  %1796 = vmatpush.msrb.mxu3 %v3481_v33  ;;  %1737 = vmatpush.msra.mxu0 %v3485_v37 }
 0x2d9   : > { %v1264_v36 = vmul.f32 0.5, %v1263_v59 }
 0x2da   : > { %v2519_v54 = vpop.eup %2518  ;;  %1797 = vmatpush.msrb.mxu3 %v3493_v47  ;;  %1738 = vmatpush.msra.mxu0 %v3497_v34 }
 0x2db   : > { %v1270_v44 = vmul.f32 %v1264_v36, %v3414_v51  ;;  %v1271_v12 = vmul.f32 %v2519_v54, %v1260_v42  ;;  %v3958_v54 = vld [vmem:[#allocation22_spill] sm:$0xff] }
 0x2dc   : > { %v2521_v49 = vpop.eup %2520  ;;  %1798 = vmatpush.msrb.mxu3 %v3505_v53  ;;  %1739 = vmatpush.msra.mxu0 %v3509_v56 }
 0x2dd   : > { %v1272_v52 = vadd.f32 %v1271_v12, %v1270_v44  ;;  %v1268_v51 = vadd.f32 1.0, %v2521_v49  ;;  %1783 = vmatpush.msrb.mxu2 %v3958_v54  ;;  %v3959_v44 = vld [vmem:[#allocation23_spill] sm:$0xff]  ;;  %v3960_v12 = vld [vmem:[#allocation24_spill] sm:$0xff] }
 0x2de   : > { %1799 = vmatpush.msrb.mxu3 %v3517_v63  ;;  %1740 = vmatpush.msra.mxu0 %v3521_v1  ;;  %v1490_v49 = vld [vmem:[#allocation4 + $0x8] sm:$0xff] }
 0x2df   : > { %2522 = vtanh.f32 %v1272_v52  ;;  %1278 = vst [vmem:[#allocation5 + $0x8] sm:$0xff] %v1272_v52  ;;  %v1269_v59 = vmul.f32 0.5, %v1268_v51  ;;  %v3961_v52 = vld [vmem:[#allocation25_spill] sm:$0xff]  ;;  %1784 = vmatpush.msrb.mxu2 %v3575_v45  ;;  %v3962_v51 = vld [vmem:[#allocation26_spill] sm:$0xff] }
 0x2e0   : > { %1800 = vmatpush.msrb.mxu3 %v3529_v4  ;;  %1741 = vmatpush.msra.mxu0 %v3533_v5 }
 0x2e1   : > { %1764 = vmatpush.msra.mxu1 %v3961_v52  ;;  %1785 = vmatpush.msrb.mxu2 %v3588_v6 }
 0x2e2   : > { %1801 = vmatpush.msrb.mxu3 %v3541_v8  ;;  %1742 = vmatpush.msra.mxu0 %v3545_v11 }
 0x2e3   : > { %1786 = vmatpush.msrb.mxu2 %v3598_v0 }
 0x2e4   : > { %1802 = vmatpush.msrb.mxu3 %v3553_v35  ;;  %1743 = vmatpush.msra.mxu0 %v3557_v31 }
 0x2e5   : > { %v2523_v42 = vpop.eup %2522  ;;  %1787 = vmatpush.msrb.mxu2 %v3610_v58 }
 0x2e6   : > { %v1274_v36 = vmul.f32 %v2523_v42, %v1269_v59  ;;  %1803 = vmatpush.msrb.mxu3 %v3959_v44  ;;  %1744 = vmatpush.msra.mxu0 %v3960_v12  ;;  %v3963_v59 = vld [vmem:[#allocation27_spill] sm:$0xff]  ;;  %v3964_v42 = vld [vmem:[#allocation28_spill] sm:$0xff]  ;;  %v3966_v12 = vld [vmem:[#allocation30_spill] sm:$0xff] }
 0x2e7   : > { %1765 = vmatpush.msra.mxu1 %v3964_v42 }
 0x2e8   : > { %1277 = vst [vmem:[#allocation4] sm:$0xff] %v1274_v36  ;;  %1382 = vmatmul.f32.gmra.mxu0 %v1274_v36  ;;  %1411 = vmatmul.f32.gmra.mxu1 %v1274_v36 }
 0x2e9   : > { %1440 = vmatmul.f32.gmra.mxu2 %v1274_v36  ;;  %1469 = vmatmul.f32.gmra.mxu3 %v1274_v36  ;;  %v3965_v36 = vld [vmem:[#allocation29_spill] sm:$0xff] }
 0x2ea   : > { %1804 = vmatpush.msrb.mxu3 %v3962_v51  ;;  %1745 = vmatpush.msra.mxu0 %v3963_v59 }
 0x2eb   : > { %1766 = vmatpush.msra.mxu1 %v3966_v12 }
 0x2ec   : > { %1805 = vmatpush.msrb.mxu3 %v3590_v39  ;;  %1746 = vmatpush.msra.mxu0 %v3965_v36 }
 0x2ed   : > { %1767 = vmatpush.msra.mxu1 %v3606_v41 }
 0x2ee   : > { %1806 = vmatpush.msrb.mxu3 %v3600_v24  ;;  %1747 = vmatpush.msra.mxu0 %v3604_v48 }
 0x2f0   : > { %1577 = vmatmul.f32.vlgmr.msrb.gmra.mxu0 %v1490_v49  ;;  %1597 = vmatmul.f32.vlgmr.msrb.gmra.mxu1 %v1490_v49 }
 0x2f1   : > { %1617 = vmatmul.f32.vlgmr.msra.gmra.mxu2 %v1490_v49  ;;  %1637 = vmatmul.f32.vlgmr.msra.gmra.mxu3 %v1490_v49 }
 0x2f2   : > { %1807 = vmatpush.msrb.mxu3 %v3612_v46  ;;  %1903 = vmatpush.msrb.mxu0 %v3425_v20 }
 0x2f3   : > { %1923 = vmatpush.msrb.mxu1 %v3427_v10  ;;  %1943 = vmatpush.msra.mxu2 %v3429_v13  ;;  %v3967_v10 = vld [vmem:[#allocation24_spill] sm:$0xff]  ;;  %v1374_v13 = vpop.f32.mrf.mxu0 }
 0x2f4   : > { %1963 = vmatpush.msra.mxu3 %v3433_v32  ;;  %1904 = vmatpush.msrb.mxu0 %v3437_v16  ;;  %v1403_v32 = vpop.f32.mrf.mxu1 }
 0x2f5   : > { %1924 = vmatpush.msrb.mxu1 %v3439_v15  ;;  %1944 = vmatpush.msra.mxu2 %v3441_v21  ;;  %v1432_v15 = vpop.f32.mrf.mxu2  ;;  %v1461_v21 = vpop.f32.mrf.mxu3 }
 0x2f6   : > { %1964 = vmatpush.msra.mxu3 %v3445_v27  ;;  %1905 = vmatpush.msrb.mxu0 %v3449_v60 }
 0x2f7   : > { %1925 = vmatpush.msrb.mxu1 %v3451_v62  ;;  %1945 = vmatpush.msra.mxu2 %v3453_v7 }
 0x2f8   : > { %1965 = vmatpush.msra.mxu3 %v3457_v9  ;;  %1906 = vmatpush.msrb.mxu0 %v3461_v23 }
 0x2f9   : > { %1926 = vmatpush.msrb.mxu1 %v3463_v26  ;;  %1946 = vmatpush.msra.mxu2 %v3465_v14 }
 0x2fa   : > { %1966 = vmatpush.msra.mxu3 %v3469_v19  ;;  %1907 = vmatpush.msrb.mxu0 %v3473_v22 }
 0x2fb   : > { %1927 = vmatpush.msrb.mxu1 %v3475_v25  ;;  %1947 = vmatpush.msra.mxu2 %v3477_v29  ;;  %v3751_v27 = vpop.f32.mrf.mxu0  ;;  %v1347_v29 = vld [vmem:[%s3907_s6] sm:$0xf] }
 0x2fc   : > { %1967 = vmatpush.msra.mxu3 %v3481_v33  ;;  %1908 = vmatpush.msrb.mxu0 %v3485_v37  ;;  %v3753_v62 = vpop.f32.mrf.mxu1 }
 0x2fd   : > { %1928 = vmatpush.msrb.mxu1 %v3487_v40  ;;  %1948 = vmatpush.msra.mxu2 %v3489_v43  ;;  %v3755_v7 = vpop.f32.mrf.mxu2  ;;  %v3757_v9 = vpop.f32.mrf.mxu3  ;;  %v3774_v43 = vperm.slane %v1347_v29, 0 }
 0x2fe   : > { %1968 = vmatpush.msra.mxu3 %v3493_v47  ;;  %1909 = vmatpush.msrb.mxu0 %v3497_v34  ;;  %v3776_v47 = vperm.slane %v1347_v29, 1 }
 0x2ff   : > { %1929 = vmatpush.msrb.mxu1 %v3499_v38  ;;  %1949 = vmatpush.msra.mxu2 %v3501_v50  ;;  %v1375_v38 = vadd.f32 %v1374_v13, %v3774_v43 }
 0x300   : > { %1969 = vmatpush.msra.mxu3 %v3505_v53  ;;  %1910 = vmatpush.msrb.mxu0 %v3509_v56  ;;  %v1404_v50 = vadd.f32 %v1403_v32, %v3776_v47 }
 0x301   : > { %1930 = vmatpush.msrb.mxu1 %v3511_v57  ;;  %1950 = vmatpush.msra.mxu2 %v3513_v61 }
 0x302   : > { %1970 = vmatpush.msra.mxu3 %v3517_v63  ;;  %1911 = vmatpush.msrb.mxu0 %v3521_v1 }
 0x303   : > { %1931 = vmatpush.msrb.mxu1 %v3523_v2  ;;  %1951 = vmatpush.msra.mxu2 %v3525_v3  ;;  %v3759_v26 = vpop.f32.mrf.mxu0 }
 0x304   : > { %1971 = vmatpush.msra.mxu3 %v3529_v4  ;;  %1912 = vmatpush.msrb.mxu0 %v3533_v5  ;;  %v3761_v14 = vpop.f32.mrf.mxu1  ;;  %v3784_v4 = vperm.slane %v1347_v29, 2 }
 0x305   : > { %1932 = vmatpush.msrb.mxu1 %v3535_v55  ;;  %1952 = vmatpush.msra.mxu2 %v3537_v30  ;;  %v3763_v19 = vpop.f32.mrf.mxu2  ;;  %v3765_v25 = vpop.f32.mrf.mxu3  ;;  %v3786_v55 = vperm.slane %v1347_v29, 3 }
 0x306   : > { %1972 = vmatpush.msra.mxu3 %v3541_v8  ;;  %1913 = vmatpush.msrb.mxu0 %v3545_v11 }
 0x307   : > { %1933 = vmatpush.msrb.mxu1 %v3547_v17  ;;  %1953 = vmatpush.msra.mxu2 %v3549_v28  ;;  %v1433_v17 = vadd.f32 %v1432_v15, %v3784_v4  ;;  %v1462_v28 = vadd.f32 %v1461_v21, %v3786_v55 }
 0x308   : > { %1973 = vmatpush.msra.mxu3 %v3553_v35  ;;  %1914 = vmatpush.msrb.mxu0 %v3557_v31 }
 0x309   : > { %1934 = vmatpush.msrb.mxu1 %v3559_v18  ;;  %1954 = vmatpush.msra.mxu2 %v3958_v54 }
 0x30a   : > { %1974 = vmatpush.msra.mxu3 %v3959_v44  ;;  %1915 = vmatpush.msrb.mxu0 %v3967_v10 }
 0x30b   : > { %1935 = vmatpush.msrb.mxu1 %v3961_v52  ;;  %1955 = vmatpush.msra.mxu2 %v3575_v45 }
 0x30c   : > { %1975 = vmatpush.msra.mxu3 %v3962_v51  ;;  %1916 = vmatpush.msrb.mxu0 %v3963_v59 }
 0x30d   : > { %1936 = vmatpush.msrb.mxu1 %v3964_v42  ;;  %1956 = vmatpush.msra.mxu2 %v3588_v6 }
 0x30e   : > { %1976 = vmatpush.msra.mxu3 %v3590_v39  ;;  %1917 = vmatpush.msrb.mxu0 %v3965_v36 }
 0x30f   : > { %1937 = vmatpush.msrb.mxu1 %v3966_v12  ;;  %1957 = vmatpush.msra.mxu2 %v3598_v0 }
 0x310   : > { %1977 = vmatpush.msra.mxu3 %v3600_v24  ;;  %1918 = vmatpush.msrb.mxu0 %v3604_v48 }
 0x311   : > { %1938 = vmatpush.msrb.mxu1 %v3606_v41  ;;  %1958 = vmatpush.msra.mxu2 %v3610_v58 }
 0x312   : > { %1978 = vmatpush.msra.mxu3 %v3612_v46 }
 0x365   : > { %v3770_v33 = vpop.f32.mrf.mxu0  ;;  %v3772_v40 = vpop.f32.mrf.mxu1 }
 0x36c   : > { %v3780_v53 = vpop.f32.mrf.mxu2  ;;  %v3782_v57 = vpop.f32.mrf.mxu3 }
 0x36d   : > { %3968 = vst [vmem:[#allocation22_spill] sm:$0xff] %v3782_v57  ;;  %v1578_v61 = vpop.f32.mrf.mxu0  ;;  %v1598_v63 = vpop.f32.mrf.mxu1 }
 0x36e   : > { %v1641_v2 = vadd.f32 %v1578_v61, %v1375_v38  ;;  %v1642_v3 = vadd.f32 %v1598_v63, %v1404_v50  ;;  %v1492_v61 = vld [vmem:[#allocation5] sm:$0xff] }
 0x370   : > { %v1645_v30 = vmul.f32 0.5, %v1641_v2  ;;  %v1649_v8 = vmul.f32 0.5, %v1642_v3 }
 0x372   : > { %2524 = vtanh.f32 %v1645_v30 }
 0x373   : > { %2526 = vtanh.f32 %v1649_v8 }
 0x374   : > { %v1618_v35 = vpop.f32.mrf.mxu2  ;;  %v1638_v18 = vpop.f32.mrf.mxu3 }
 0x375   : > { %v1643_v54 = vadd.f32 %v1618_v35, %v1433_v17  ;;  %v1644_v44 = vadd.f32 %v1638_v18, %v1462_v28 }
 0x377   : > { %2528 = vtanh.f32 %v1643_v54  ;;  %v1654_v49 = vmul.f32 0.5, %v1644_v44 }
 0x378   : > { %v2525_v13 = vpop.eup %2524 }
 0x379   : > { %v2527_v32 = vpop.eup %2526  ;;  %v1647_v38 = vadd.f32 1.0, %v2525_v13  ;;  %2530 = vtanh.f32 %v1654_v49 }
 0x37a   : > { %v1651_v50 = vadd.f32 1.0, %v2527_v32 }
 0x37b   : > { %v1648_v29 = vmul.f32 0.5, %v1647_v38 }
 0x37c   : > { %v1652_v63 = vmul.f32 0.5, %v1651_v50 }
 0x37d   : > { %v2529_v2 = vpop.eup %2528 }
 0x37e   : > { %v1658_v3 = vmul.f32 %v1652_v63, %v1492_v61  ;;  %v1659_v15 = vmul.f32 %v2529_v2, %v1648_v29  ;;  %v2067_v2 = vld [vmem:[#allocation11 + $0x1c8] sm:$0xff] }
 0x37f   : > { %v2531_v30 = vpop.eup %2530 }
 0x380   : > { %v1660_v21 = vadd.f32 %v1659_v15, %v1658_v3  ;;  %v1656_v8 = vadd.f32 1.0, %v2531_v30  ;;  %v2068_v3 = vld [vmem:[#allocation11 + $0x1d0] sm:$0xff]  ;;  %v2069_v15 = vld [vmem:[#allocation11 + $0x1d8] sm:$0xff]  ;;  %v2063_v30 = vld [vmem:[#allocation11 + $0x1a8] sm:$0xff] }
 0x382   : > { %2532 = vtanh.f32 %v1660_v21  ;;  %v1657_v57 = vmul.f32 0.5, %v1656_v8  ;;  %v2065_v8 = vld [vmem:[#allocation11 + $0x1b8] sm:$0xff] }
 0x388   : > { %v2533_v17 = vpop.eup %2532 }
 0x389   : > { %v3790_v28 = vmul.f32 %v2533_v17, %v1657_v57  ;;  %v2059_v17 = vld [vmem:[#allocation11 + $0x188] sm:$0xff] }
 0x38b   : > { %1748 = vmatmul.f32.vlgmr.msra.gmra.mxu0 %v3790_v28  ;;  %1768 = vmatmul.f32.vlgmr.msra.gmra.mxu1 %v3790_v28 }
 0x38c   : > { %1788 = vmatmul.f32.vlgmr.msrb.gmra.mxu2 %v3790_v28  ;;  %1808 = vmatmul.f32.vlgmr.msrb.gmra.mxu3 %v3790_v28 }
 0x38d   : > { %2074 = vmatpush.msra.mxu0 %v3425_v20  ;;  %v1378_v20 = vadd.f32 %v3751_v27, %v3774_v43 }
 0x38f   : > { %2075 = vmatpush.msra.mxu0 %v3437_v16  ;;  %v1407_v16 = vadd.f32 %v3753_v62, %v3776_v47 }
 0x391   : > { %2076 = vmatpush.msra.mxu0 %v3449_v60  ;;  %v2071_v60 = vld [vmem:[#allocation11 + $0x1e8] sm:$0xff] }
 0x392   : > { %2094 = vmatpush.msra.mxu1 %v2071_v60  ;;  %v2055_v60 = vld [vmem:[#allocation11 + $0x168] sm:$0xff] }
 0x393   : > { %2077 = vmatpush.msra.mxu0 %v3461_v23  ;;  %v2072_v23 = vld [vmem:[#allocation11 + $0x1f0] sm:$0xff] }
 0x394   : > { %2114 = vmatpush.msrb.mxu2 %v2072_v23  ;;  %2095 = vmatpush.msra.mxu1 %v2067_v2  ;;  %v2056_v23 = vld [vmem:[#allocation11 + $0x170] sm:$0xff] }
 0x395   : > { %2078 = vmatpush.msra.mxu0 %v3473_v22  ;;  %v2073_v22 = vld [vmem:[#allocation11 + $0x1f8] sm:$0xff]  ;;  %v2028_v2 = vld [vmem:[#allocation11 + $0x90] sm:$0xff] }
 0x396   : > { %2134 = vmatpush.msrb.mxu3 %v2073_v22  ;;  %2115 = vmatpush.msrb.mxu2 %v2068_v3  ;;  %v2057_v22 = vld [vmem:[#allocation11 + $0x178] sm:$0xff] }
 0x397   : > { %2079 = vmatpush.msra.mxu0 %v3485_v37  ;;  %2096 = vmatpush.msra.mxu1 %v2063_v30  ;;  %v2029_v3 = vld [vmem:[#allocation11 + $0x98] sm:$0xff] }
 0x398   : > { %2135 = vmatpush.msrb.mxu3 %v2069_v15  ;;  %v2191_v15 = vld [vmem:[#allocation12 + $0x40] sm:$0xff]  ;;  %v2190_v30 = vld [vmem:[#allocation12 + $0x38] sm:$0xff] }
 0x399   : > { %2080 = vmatpush.msra.mxu0 %v3497_v34  ;;  %2097 = vmatpush.msra.mxu1 %v2059_v17  ;;  %v2184_v17 = vld [vmem:[#allocation12 + $0x8] sm:$0xff] }
 0x39a   : > { %2136 = vmatpush.msrb.mxu3 %v2065_v8  ;;  %v2188_v8 = vld [vmem:[#allocation12 + $0x28] sm:$0xff] }
 0x39b   : > { %2081 = vmatpush.msra.mxu0 %v3509_v56  ;;  %2098 = vmatpush.msra.mxu1 %v2055_v60 }
 0x39d   : > { %2082 = vmatpush.msra.mxu0 %v3521_v1 }
 0x39f   : > { %2083 = vmatpush.msra.mxu0 %v3533_v5 }
 0x3a1   : > { %2084 = vmatpush.msra.mxu0 %v3545_v11 }
 0x3a3   : > { %2085 = vmatpush.msra.mxu0 %v3557_v31  ;;  %v1436_v31 = vadd.f32 %v3755_v7, %v3784_v4 }
 0x3a5   : > { %2086 = vmatpush.msra.mxu0 %v3967_v10 }
 0x3a7   : > { %2087 = vmatpush.msra.mxu0 %v3963_v59 }
 0x3a9   : > { %2088 = vmatpush.msra.mxu0 %v3965_v36 }
 0x3ab   : > { %2089 = vmatpush.msra.mxu0 %v3604_v48  ;;  %v1465_v48 = vadd.f32 %v3757_v9, %v3786_v55 }
 0x408   : > { %v1749_v37 = vpop.f32.mrf.mxu0  ;;  %v1769_v34 = vpop.f32.mrf.mxu1 }
 0x409   : > { %v1812_v56 = vadd.f32 %v1749_v37, %v1378_v20  ;;  %v1813_v1 = vadd.f32 %v1769_v34, %v1407_v16  ;;  %v2060_v20 = vld [vmem:[#allocation11 + $0x190] sm:$0xff]  ;;  %v2061_v16 = vld [vmem:[#allocation11 + $0x198] sm:$0xff]  ;;  %v2051_v34 = vld [vmem:[#allocation11 + $0x148] sm:$0xff] }
 0x40a   : > { %2137 = vmatpush.msrb.mxu3 %v2061_v16  ;;  %v2198_v37 = vld [vmem:[#allocation12 + $0x78] sm:$0xff]  ;;  %2099 = vmatpush.msra.mxu1 %v2051_v34 }
 0x40b   : > { %v1816_v5 = vmul.f32 0.5, %v1812_v56  ;;  %v1820_v11 = vmul.f32 0.5, %v1813_v1  ;;  %v2052_v56 = vld [vmem:[#allocation11 + $0x150] sm:$0xff]  ;;  %v2053_v1 = vld [vmem:[#allocation11 + $0x158] sm:$0xff] }
 0x40c   : > { %2138 = vmatpush.msrb.mxu3 %v2057_v22 }
 0x40d   : > { %2534 = vtanh.f32 %v1816_v5  ;;  %v2197_v5 = vld [vmem:[#allocation12 + $0x70] sm:$0xff] }
 0x40e   : > { %2536 = vtanh.f32 %v1820_v11  ;;  %2139 = vmatpush.msrb.mxu3 %v2053_v1  ;;  %v2047_v11 = vld [vmem:[#allocation11 + $0x128] sm:$0xff] }
 0x40f   : > { %v1789_v59 = vpop.f32.mrf.mxu2  ;;  %v1809_v36 = vpop.f32.mrf.mxu3  ;;  %2100 = vmatpush.msra.mxu1 %v2047_v11 }
 0x410   : > { %v1814_v10 = vadd.f32 %v1789_v59, %v1436_v31  ;;  %v1815_v27 = vadd.f32 %v1809_v36, %v1465_v48  ;;  %v2048_v31 = vld [vmem:[#allocation11 + $0x130] sm:$0xff]  ;;  %v2049_v48 = vld [vmem:[#allocation11 + $0x138] sm:$0xff]  ;;  %v2196_v59 = vld [vmem:[#allocation12 + $0x68] sm:$0xff] }
 0x411   : > { %2140 = vmatpush.msrb.mxu3 %v2049_v48  ;;  %v2043_v36 = vld [vmem:[#allocation11 + $0x108] sm:$0xff] }
 0x412   : > { %2538 = vtanh.f32 %v1814_v10  ;;  %v1825_v62 = vmul.f32 0.5, %v1815_v27  ;;  %v2044_v10 = vld [vmem:[#allocation11 + $0x110] sm:$0xff]  ;;  %v2045_v27 = vld [vmem:[#allocation11 + $0x118] sm:$0xff]  ;;  %2101 = vmatpush.msra.mxu1 %v2043_v36 }
 0x413   : > { %v2535_v57 = vpop.eup %2534  ;;  %2141 = vmatpush.msrb.mxu3 %v2045_v27 }
 0x414   : > { %v2537_v35 = vpop.eup %2536  ;;  %v1818_v18 = vadd.f32 1.0, %v2535_v57  ;;  %2540 = vtanh.f32 %v1825_v62  ;;  %v2195_v62 = vld [vmem:[#allocation12 + $0x60] sm:$0xff]  ;;  %v2039_v57 = vld [vmem:[#allocation11 + $0xe8] sm:$0xff] }
 0x415   : > { %v1822_v54 = vadd.f32 1.0, %v2537_v35  ;;  %v2040_v35 = vld [vmem:[#allocation11 + $0xf0] sm:$0xff]  ;;  %2102 = vmatpush.msra.mxu1 %v2039_v57  ;;  %v1413_v57 = vadd.f32 %v3772_v40, %v3776_v47 }
 0x416   : > { %v1819_v44 = vmul.f32 0.5, %v1818_v18  ;;  %v2041_v18 = vld [vmem:[#allocation11 + $0xf8] sm:$0xff] }
 0x417   : > { %v1823_v49 = vmul.f32 0.5, %v1822_v54  ;;  %v2194_v54 = vld [vmem:[#allocation12 + $0x58] sm:$0xff]  ;;  %2142 = vmatpush.msrb.mxu3 %v2041_v18 }
 0x418   : > { %v2539_v13 = vpop.eup %2538 }
 0x419   : > { %v1829_v32 = vmul.f32 %v1823_v49, %v1660_v21  ;;  %v1830_v7 = vmul.f32 %v2539_v13, %v1819_v44  ;;  %v2064_v21 = vld [vmem:[#allocation11 + $0x1b0] sm:$0xff]  ;;  %v2035_v44 = vld [vmem:[#allocation11 + $0xc8] sm:$0xff]  ;;  %v2037_v13 = vld [vmem:[#allocation11 + $0xd8] sm:$0xff] }
 0x41a   : > { %v2541_v38 = vpop.eup %2540  ;;  %2116 = vmatpush.msrb.mxu2 %v2064_v21  ;;  %v2036_v49 = vld [vmem:[#allocation11 + $0xd0] sm:$0xff]  ;;  %2103 = vmatpush.msra.mxu1 %v2035_v44 }
 0x41b   : > { %v3820_v50 = vadd.f32 %v1830_v7, %v1829_v32  ;;  %v1827_v9 = vadd.f32 1.0, %v2541_v38  ;;  %v2193_v32 = vld [vmem:[#allocation12 + $0x50] sm:$0xff]  ;;  %2143 = vmatpush.msrb.mxu3 %v2037_v13  ;;  %v2031_v7 = vld [vmem:[#allocation11 + $0xa8] sm:$0xff] }
 0x41c   : > { %2117 = vmatpush.msrb.mxu2 %v2060_v20  ;;  %v2032_v38 = vld [vmem:[#allocation11 + $0xb0] sm:$0xff]  ;;  %2104 = vmatpush.msra.mxu1 %v2031_v7  ;;  %v2183_v20 = vld [vmem:[#allocation12] sm:$0xff] }
 0x41d   : > { %2542 = vtanh.f32 %v3820_v50  ;;  %v1828_v29 = vmul.f32 0.5, %v1827_v9  ;;  %v2033_v9 = vld [vmem:[#allocation11 + $0xb8] sm:$0xff]  ;;  %v2189_v21 = vld [vmem:[#allocation12 + $0x30] sm:$0xff] }
 0x41e   : > { %2118 = vmatpush.msrb.mxu2 %v2056_v23  ;;  %2144 = vmatpush.msrb.mxu3 %v2033_v9 }
 0x420   : > { %2119 = vmatpush.msrb.mxu2 %v2052_v56  ;;  %2145 = vmatpush.msrb.mxu3 %v2029_v3 }
 0x422   : > { %2120 = vmatpush.msrb.mxu2 %v2048_v31  ;;  %2146 = vmatpush.msrb.mxu3 %v3962_v51 }
 0x423   : > { %v2543_v61 = vpop.eup %2542 }
 0x424   : > { %v3823_v63 = vmul.f32 %v2543_v61, %v1828_v29  ;;  %2121 = vmatpush.msrb.mxu2 %v2044_v10  ;;  %v2192_v29 = vld [vmem:[#allocation12 + $0x48] sm:$0xff]  ;;  %2147 = vmatpush.msrb.mxu3 %v3590_v39  ;;  %v1381_v39 = vadd.f32 %v3759_v26, %v3774_v43  ;;  %v1468_v26 = vadd.f32 %v3765_v25, %v3786_v55 }
 0x425   : > { %v2027_v61 = vld [vmem:[#allocation11 + $0x88] sm:$0xff] }
 0x426   : > { %1919 = vmatmul.f32.vlgmr.msrb.gmra.mxu0 %v3823_v63  ;;  %1939 = vmatmul.f32.vlgmr.msrb.gmra.mxu1 %v3823_v63 }
 0x427   : > { %1959 = vmatmul.f32.vlgmr.msra.gmra.mxu2 %v3823_v63  ;;  %1979 = vmatmul.f32.vlgmr.msra.gmra.mxu3 %v3823_v63 }
 0x428   : > { %2203 = vmatpush.msrb.mxu0 %v2198_v37  ;;  %2122 = vmatpush.msrb.mxu2 %v2040_v35 }
 0x429   : > { %2105 = vmatpush.msra.mxu1 %v2027_v61  ;;  %2148 = vmatpush.msrb.mxu3 %v3600_v24 }
 0x42a   : > { %2204 = vmatpush.msrb.mxu0 %v2197_v5  ;;  %2123 = vmatpush.msrb.mxu2 %v2036_v49 }
 0x42b   : > { %2106 = vmatpush.msra.mxu1 %v3961_v52  ;;  %2149 = vmatpush.msrb.mxu3 %v3612_v46  ;;  %v2185_v52 = vld [vmem:[#allocation12 + $0x10] sm:$0xff]  ;;  %v1439_v46 = vadd.f32 %v3763_v19, %v3784_v4 }
 0x42c   : > { %2205 = vmatpush.msrb.mxu0 %v2196_v59  ;;  %2124 = vmatpush.msrb.mxu2 %v2032_v38 }
 0x42d   : > { %2107 = vmatpush.msra.mxu1 %v3964_v42 }
 0x42e   : > { %2206 = vmatpush.msrb.mxu0 %v2195_v62  ;;  %2125 = vmatpush.msrb.mxu2 %v2028_v2 }
 0x42f   : > { %2108 = vmatpush.msra.mxu1 %v3966_v12  ;;  %v2186_v12 = vld [vmem:[#allocation12 + $0x18] sm:$0xff] }
 0x430   : > { %2207 = vmatpush.msrb.mxu0 %v2194_v54  ;;  %2126 = vmatpush.msrb.mxu2 %v3575_v45  ;;  %v2187_v45 = vld [vmem:[#allocation12 + $0x20] sm:$0xff] }
 0x431   : > { %2109 = vmatpush.msra.mxu1 %v3606_v41 }
 0x432   : > { %2208 = vmatpush.msrb.mxu0 %v2193_v32  ;;  %2127 = vmatpush.msrb.mxu2 %v3588_v6  ;;  %v1410_v6 = vadd.f32 %v3761_v14, %v3776_v47 }
 0x434   : > { %2209 = vmatpush.msrb.mxu0 %v2192_v29  ;;  %2128 = vmatpush.msrb.mxu2 %v3598_v0 }
 0x436   : > { %2210 = vmatpush.msrb.mxu0 %v2191_v15  ;;  %2129 = vmatpush.msrb.mxu2 %v3610_v58 }
 0x438   : > { %2211 = vmatpush.msrb.mxu0 %v2190_v30 }
 0x43a   : > { %2212 = vmatpush.msrb.mxu0 %v2189_v21 }
 0x43c   : > { %2213 = vmatpush.msrb.mxu0 %v2188_v8 }
 0x43e   : > { %2214 = vmatpush.msrb.mxu0 %v2187_v45 }
 0x440   : > { %2215 = vmatpush.msrb.mxu0 %v2186_v12 }
 0x442   : > { %2216 = vmatpush.msrb.mxu0 %v2185_v52 }
 0x444   : > { %2217 = vmatpush.msrb.mxu0 %v2184_v17 }
 0x446   : > { %2218 = vmatpush.msrb.mxu0 %v2183_v20 }
 0x4a3   : > { %v1920_v0 = vpop.f32.mrf.mxu0  ;;  %v1940_v51 = vpop.f32.mrf.mxu1 }
 0x4a4   : > { %v1983_v24 = vadd.f32 %v1920_v0, %v1381_v39  ;;  %v1984_v42 = vadd.f32 %v1940_v51, %v1410_v6 }
 0x4a6   : > { %v1987_v41 = vmul.f32 0.5, %v1983_v24  ;;  %v1991_v58 = vmul.f32 0.5, %v1984_v42 }
 0x4a8   : > { %2544 = vtanh.f32 %v1987_v41 }
 0x4a9   : > { %2546 = vtanh.f32 %v1991_v58 }
 0x4aa   : > { %v1960_v14 = vpop.f32.mrf.mxu2  ;;  %v1980_v16 = vpop.f32.mrf.mxu3 }
 0x4ab   : > { %v1985_v60 = vadd.f32 %v1960_v14, %v1439_v46  ;;  %v1986_v23 = vadd.f32 %v1980_v16, %v1468_v26 }
 0x4ad   : > { %2548 = vtanh.f32 %v1985_v60  ;;  %v1996_v22 = vmul.f32 0.5, %v1986_v23 }
 0x4ae   : > { %v2545_v37 = vpop.eup %2544 }
 0x4af   : > { %v2547_v34 = vpop.eup %2546  ;;  %v1989_v56 = vadd.f32 1.0, %v2545_v37  ;;  %2550 = vtanh.f32 %v1996_v22 }
 0x4b0   : > { %v1993_v1 = vadd.f32 1.0, %v2547_v34 }
 0x4b1   : > { %v1990_v5 = vmul.f32 0.5, %v1989_v56 }
 0x4b2   : > { %v1994_v11 = vmul.f32 0.5, %v1993_v1 }
 0x4b3   : > { %v2549_v31 = vpop.eup %2548 }
 0x4b4   : > { %v2000_v19 = vmul.f32 %v1994_v11, %v3820_v50  ;;  %v2001_v48 = vmul.f32 %v2549_v31, %v1990_v5  ;;  %v1384_v50 = vadd.f32 %v3770_v33, %v3774_v43  ;;  %v3969_v33 = vld [vmem:[#allocation22_spill] sm:$0xff] }
 0x4b5   : > { %v2551_v25 = vpop.eup %2550  ;;  %v1471_v43 = vadd.f32 %v3969_v33, %v3786_v55 }
 0x4b6   : > { %v2002_v59 = vadd.f32 %v2001_v48, %v2000_v19  ;;  %v1998_v36 = vadd.f32 1.0, %v2551_v25 }
 0x4b8   : > { %2552 = vtanh.f32 %v2002_v59  ;;  %v1999_v10 = vmul.f32 0.5, %v1998_v36 }
 0x4be   : > { %v2553_v27 = vpop.eup %2552 }
 0x4bf   : > { %v2004_v62 = vmul.f32 %v2553_v27, %v1999_v10 }
 0x4c1   : > { %2090 = vmatmul.f32.vlgmr.msra.gmra.mxu0 %v2004_v62  ;;  %2110 = vmatmul.f32.vlgmr.msra.gmra.mxu1 %v2004_v62 }
 0x4c2   : > { %2130 = vmatmul.f32.vlgmr.msrb.gmra.mxu2 %v2004_v62  ;;  %2150 = vmatmul.f32.vlgmr.msrb.gmra.mxu3 %v2004_v62 }
 0x4c9   : > { %2219 = vmatmul.f32.vlgmr.msrb.gmra.mxu0 %v3790_v28  ;;  %v2483_v28 = vld [vmem:[%s3909_s8] ss:$0 sm:$0xff] }
 0x4d1   : > { %2222 = vmatmul.f32.gmra.mxu0 %v3823_v63  ;;  %v1442_v63 = vadd.f32 %v3780_v53, %v3784_v4 }
 0x4d9   : > { %2225 = vmatmul.f32.gmra.mxu0 %v2004_v62 }
 0x53e   : > { %v2091_v35 = vpop.f32.mrf.mxu0  ;;  %v2111_v18 = vpop.f32.mrf.mxu1 }
 0x53f   : > { %v2154_v54 = vadd.f32 %v2091_v35, %v1384_v50  ;;  %v2155_v44 = vadd.f32 %v2111_v18, %v1413_v57 }
 0x541   : > { %v2158_v49 = vmul.f32 0.5, %v2154_v54  ;;  %v2162_v13 = vmul.f32 0.5, %v2155_v44 }
 0x543   : > { %2554 = vtanh.f32 %v2158_v49 }
 0x544   : > { %2556 = vtanh.f32 %v2162_v13 }
 0x545   : > { %v2131_v40 = vpop.f32.mrf.mxu2  ;;  %v2151_v47 = vpop.f32.mrf.mxu3 }
 0x546   : > { %v2156_v32 = vadd.f32 %v2131_v40, %v1442_v63  ;;  %v2157_v7 = vadd.f32 %v2151_v47, %v1471_v43  ;;  %v2220_v38 = vpop.f32.mrf.mxu0 }
 0x547   : > { %v2221_v9 = vadd.f32 %v2483_v28, %v2220_v38 }
 0x548   : > { %2558 = vtanh.f32 %v2156_v32  ;;  %v2167_v29 = vmul.f32 0.5, %v2157_v7 }
 0x549   : > { %v2555_v61 = vpop.eup %2554  ;;  %2232 = vst [vmem:[%s2926_s28] sm:$0xff] %v2221_v9 }
 0x54a   : > { %v2557_v2 = vpop.eup %2556  ;;  %v2160_v3 = vadd.f32 1.0, %v2555_v61  ;;  %2560 = vtanh.f32 %v2167_v29 }
 0x54b   : > { %v2164_v15 = vadd.f32 1.0, %v2557_v2 }
 0x54c   : > { %v2161_v53 = vmul.f32 0.5, %v2160_v3 }
 0x54d   : > { %v2165_v4 = vmul.f32 0.5, %v2164_v15 }
 0x54e   : > { %v2559_v55 = vpop.eup %2558  ;;  %v2223_v30 = vpop.f32.mrf.mxu0 }
 0x54f   : > { %v2171_v21 = vmul.f32 %v2165_v4, %v2002_v59  ;;  %v2172_v8 = vmul.f32 %v2559_v55, %v2161_v53  ;;  %v2224_v45 = vadd.f32 %v2483_v28, %v2223_v30 }
 0x550   : > { %v2561_v39 = vpop.eup %2560 }
 0x551   : > { %v2173_v6 = vadd.f32 %v2172_v8, %v2171_v21  ;;  %2233 = vst [vmem:[%s2926_s28 + $0x8] sm:$0xff] %v2224_v45  ;;  %v2169_v12 = vadd.f32 1.0, %v2561_v39 }
 0x553   : > { %2178 = vst [vmem:[#allocation5] sm:$0xff] %v2173_v6  ;;  %2562 = vtanh.f32 %v2173_v6  ;;  %v2170_v51 = vmul.f32 0.5, %v2169_v12 }
 0x556   : > { %v2226_v52 = vpop.f32.mrf.mxu0 }
 0x557   : > { %v2227_v0 = vadd.f32 %v2483_v28, %v2226_v52 }
 0x559   : > { %v2563_v24 = vpop.eup %2562  ;;  %2234 = vst [vmem:[%s2926_s28 + $0x10] sm:$0xff] %v2227_v0 }
 0x55a   : > { %v2175_v42 = vmul.f32 %v2563_v24, %v2170_v51 }
 0x55c   : > { %2177 = vst [vmem:[#allocation4 + $0x8] sm:$0xff] %v2175_v42  ;;  %2228 = vmatmul.f32.gmra.mxu0 %v2175_v42 }
 0x5d9   : > { %v2229_v17 = vpop.f32.mrf.mxu0 }
 0x5da   : > { %v2230_v41 = vadd.f32 %v2483_v28, %v2229_v17 }
 0x5dc   : > { %2235 = vst [vmem:[%s2926_s28 + $0x18] sm:$0xff] %v2230_v41 }
 0x5dd   : > { %2711 = shalt.err (!%p2708_p9)
}
 0x5de   : > { %s2769_s2 = smov 128   ;;  %s2770_s28 = smov 8  }
 0x5df   : > { %2412 = dma.vmem_to_hbm [thread:$0]  (%p2859_p5), %s2250_s15, 512, %s2252_s18, %s2237_s21, %s2769_s2, %s2769_s2, %s2770_s28  }
 0x5e0 PF: > { %p2439_p10 = scmp.ge.s32.totalorder %s2758_s12, 2  ;;  %s2266_s24 = sand.u32 1, %s2746_s30  }
 0x5e1   : > { %s2267_s14 = scalar_lea.sflag [#allocation8], %s2266_s24 }
 0x5e2   : > { %p2428_p11 = pnand %p2439_p10, %p2863_p6 }
 0x5e4   : > { %p2429_p12 = pneg %p2428_p11 }
 0x5e6   : > { %2741 = dma.done.wait (%p2429_p12), %s2267_s14, 512  }
 0x5e7   : > { %2743 = vsyncadd (%p2429_p12), %s2267_s14, 4294966784  ;;  %s3970_s12 = sld [smem:[#allocation20_spill]]  ;;  %s3973_s30 = smov %s2750_s10 }
 0x5e8   : > { %s3971_s22 = sld [smem:[#allocation19_spill]] }
 0x5e9   : > { %s3972_s11 = sld [smem:[#allocation21_spill]] }
 0x5ed   : > { %p22_p13 = scmp.ge.s32.totalorder %s3970_s12, 4  }
 0x5ee   : > { %s3974_s10 = smov %s3971_s22 }
 0x5ef   :  { %24 = sbr.rel (!%p22_p13) target bundleno = 9 (0x9), region = 121 }
 0x5f4   :  { %2273 = vsyncpa [#allocation7], 1 }
 0x5f5   :  { %2275 = vsyncpa [#allocation7 + $0x1], 1 }
 0x5f6   :  { %2276 = vsyncpa [#allocation10], 1 }
 0x5f7   :  { %2277 = vsyncpa [#allocation13], 1 }
 0x5f8   :  { %2278 = vsyncpa [#allocation8], 1 }
 0x5f9   :  { %2280 = vsyncpa [#allocation8 + $0x1], 1 }

</bundles_post_ra>
